<compile_context>
chip_gen: v7x
topology: tpu7x:2x2x1
jax: 0.10.0
libtpu: 0.0.40
codegen_flags: <defaults>
</compile_context>

<pallas_src>
import jax
import jax.numpy as jnp
from jax import lax
from jax.experimental import pallas as pl
from jax.experimental.pallas import tpu as pltpu


# ----------------------------- Pallas kernel --------------------------------

def _make_fused_kernel(T, B, H, L):
    """Fused bidirectional-RNN(+fc) kernel for static (T, B, H, L).

    Per layer the inputs are:
      w_ih  : (D_in, 2H) bf16   -- [W_ih_fwd | W_ih_bwd]
      whh   : (2H, 2H)  bf16    -- block-diag [[W_hh_fwd, 0], [0, W_hh_bwd]]
      b     : (1, 2H)   f32     -- [b_fwd | b_bwd] (b_ih + b_hh folded)
    Scratch:
      seq   : (T*B, 2H) bf16    -- row t*B+b = [fwd hidden(t) | bwd hidden(t)]
      xi    : (T*B, 2H) bf16    -- hoisted input projection, time-ordered
    """
    H2 = 2 * H

    def kernel(*refs):
        x_ref = refs[0]                        # (T*B, D0) bf16
        layer_refs = refs[1:1 + 3 * L]         # per layer: w_ih, whh, b
        fc_w_ref = refs[1 + 3 * L]             # (2H, O) f32
        fc_b_ref = refs[2 + 3 * L]             # (1, O)  f32
        out_ref = refs[3 + 3 * L]              # (B, O)  f32
        seq, xi = refs[4 + 3 * L:]             # VMEM scratch

        unroll = True if T <= 16 else 8        # partial unroll for long sequences

        for l in range(L):
            w_ih_ref, whh_ref, b_ref = layer_refs[3 * l: 3 * l + 3]

            # ---- hoisted input projection: ONE fused dot, both directions ----
            src = x_ref[...] if l == 0 else seq[...]          # bf16
            xi[...] = (jnp.dot(src, w_ih_ref[...],
                               preferred_element_type=jnp.float32)
                       + b_ref[...]).astype(xi.dtype)

            # Block-diagonal recurrence weight, bf16, resident across the loop.
            # TODO(synk): for H >= 128 read whh from the ref inside the partially
            #             unrolled loop instead of hoisting (vreg pressure).
            whh = whh_ref[...]                                 # (2H, 2H) bf16

            # ---- serial recurrence: one dot + one tanh per step -------------
            def step(t, h):                                    # h: (B, 2H) f32
                rf = pl.multiple_of(t * B, B)                  # fwd: time t
                rb = pl.multiple_of((T - 1 - t) * B, B)        # bwd: time T-1-t
                pre = jnp.concatenate(
                    [xi[pl.ds(rf, B), :H], xi[pl.ds(rb, B), H:]], axis=1
                ).astype(jnp.float32)
                h_new = jnp.tanh(
                    pre + jnp.dot(h.astype(jnp.bfloat16), whh,
                                  preferred_element_type=jnp.float32))
                h_b16 = h_new.astype(seq.dtype)
                seq[pl.ds(rf, B), :H] = h_b16[:, :H]           # fwd half -> row t
                seq[pl.ds(rb, B), H:] = h_b16[:, H:]           # bwd half -> row T-1-t
                return h_new

            lax.fori_loop(0, T, step, jnp.zeros((B, H2), jnp.float32),
                          unroll=unroll)

        # ---- final fc on out[:, -1, :] == [fwd[T-1] | bwd[T-1]] (one dot) ----
        last = seq[pl.ds((T - 1) * B, B), :].astype(jnp.float32)
        out = (jnp.dot(last, fc_w_ref[...], preferred_element_type=jnp.float32)
               + fc_b_ref[...])
        out_ref[...] = out.astype(out_ref.dtype)

    return kernel


# ------------------------------ Wrapper --------------------------------------

def simple_rnn_forward(x_btd, params):
    """Equivalent of SimpleRNN.forward: bidirectional multi-layer RNN + fc on last step."""
    B, T, D = x_btd.shape
    H = params["rnn"][0]["w_hh_f"].shape[0]
    O = params["fc_w"].shape[1]
    L = len(params["rnn"])
    # Pad batch to a multiple of 16 so per-step slices of the packed-bf16 scratch
    # are aligned to full sublane groups.
    Bp = max(16, ((B + 15) // 16) * 16)

    x = jnp.transpose(x_btd, (1, 0, 2))        # (T, B, D) time-major
    if Bp != B:
        x = jnp.pad(x, ((0, 0), (0, Bp - B), (0, 0)))
    x2d = x.reshape(T * Bp, D).astype(jnp.bfloat16)   # row t*Bp + b

    inputs = [x2d]
    for layer in params["rnn"]:
        w_ih = jnp.concatenate([layer["w_ih_f"], layer["w_ih_b"]],
                               axis=1).astype(jnp.bfloat16)          # (D_in, 2H)
        whh_bd = jnp.zeros((2 * H, 2 * H), jnp.float32)
        whh_bd = whh_bd.at[:H, :H].set(layer["w_hh_f"])
        whh_bd = whh_bd.at[H:, H:].set(layer["w_hh_b"])
        whh_bd = whh_bd.astype(jnp.bfloat16)                          # (2H, 2H)
        bias = jnp.concatenate([layer["b_f"], layer["b_b"]], axis=1)  # (1, 2H) f32
        inputs += [w_ih, whh_bd, bias]
    inputs += [params["fc_w"], params["fc_b"].reshape(1, O)]

    kernel = _make_fused_kernel(T=T, B=Bp, H=H, L=L)

    scratch_shapes = [
        pltpu.VMEM((T * Bp, 2 * H), jnp.bfloat16),   # seq: both directions, time-ordered
        pltpu.VMEM((T * Bp, 2 * H), jnp.bfloat16),   # xi : hoisted input projection
    ]

    # Explicit VMEM budget (bf16 scratch + all-resident operands) with headroom.
    in_bytes = sum(int(a.size) * a.dtype.itemsize for a in inputs)
    scratch_bytes = 2 * (T * Bp * 2 * H * 2)
    out_bytes = Bp * O * 4
    vmem_limit = 2 * in_bytes + scratch_bytes + out_bytes + (8 << 20)
    vmem_limit = int(min(max(vmem_limit, 32 << 20), 64 << 20))

    out = pl.pallas_call(
        kernel,
        out_shape=jax.ShapeDtypeStruct((Bp, O), jnp.float32),
        in_specs=[pl.BlockSpec(memory_space=pltpu.MemorySpace.VMEM)] * len(inputs),
        out_specs=pl.BlockSpec(memory_space=pltpu.MemorySpace.VMEM),
        scratch_shapes=scratch_shapes,
        compiler_params=pltpu.CompilerParams(vmem_limit_bytes=vmem_limit),
    )(*inputs)
    return out[:B]


# -------------------------- Pure-JAX reference -------------------------------

def _rnn_dir_ref(x, w_ih, w_hh, b):
    T, B, D = x.shape
    H = w_hh.shape[0]

    def step(h, x_t):
        h_new = jnp.tanh(x_t @ w_ih + h @ w_hh + b)
        return h_new, h_new

    _, hs = jax.lax.scan(step, jnp.zeros((B, H), jnp.float32), x)
    return hs


def simple_rnn_ref(x_btd, params):
    x = jnp.transpose(x_btd, (1, 0, 2))
    for layer in params["rnn"]:
        fwd = _rnn_dir_ref(x, layer["w_ih_f"], layer["w_hh_f"], layer["b_f"])
        bwd = _rnn_dir_ref(x[::-1], layer["w_ih_b"], layer["w_hh_b"], layer["b_b"])[::-1]
        x = jnp.concatenate([fwd, bwd], axis=-1)
    return x[-1] @ params["fc_w"] + params["fc_b"]


# ------------------------------ Param init -----------------------------------

def init_params(key, input_size, hidden_size, output_size, num_layers):
    scale = 1.0 / jnp.sqrt(hidden_size)
    layers = []
    for l in range(num_layers):
        d_in = input_size if l == 0 else 2 * hidden_size
        key, *ks = jax.random.split(key, 9)
        layers.append(dict(
            # weights stored pre-transposed: x @ W_ih, h @ W_hh
            w_ih_f=jax.random.uniform(ks[0], (d_in, hidden_size), jnp.float32, -scale, scale),
            w_hh_f=jax.random.uniform(ks[1], (hidden_size, hidden_size), jnp.float32, -scale, scale),
            b_f=jax.random.uniform(ks[2], (1, hidden_size), jnp.float32, -scale, scale)
                + jax.random.uniform(ks[3], (1, hidden_size), jnp.float32, -scale, scale),  # b_ih + b_hh
            w_ih_b=jax.random.uniform(ks[4], (d_in, hidden_size), jnp.float32, -scale, scale),
            w_hh_b=jax.random.uniform(ks[5], (hidden_size, hidden_size), jnp.float32, -scale, scale),
            b_b=jax.random.uniform(ks[6], (1, hidden_size), jnp.float32, -scale, scale)
                + jax.random.uniform(ks[7], (1, hidden_size), jnp.float32, -scale, scale),
        ))
    key, k1, k2 = jax.random.split(key, 3)
    fc_scale = 1.0 / jnp.sqrt(2 * hidden_size)
    params = dict(
        rnn=layers,
        fc_w=jax.random.uniform(k1, (2 * hidden_size, output_size), jnp.float32, -fc_scale, fc_scale),
        fc_b=jax.random.uniform(k2, (output_size,), jnp.float32, -fc_scale, fc_scale),
    )
    return params


# --------------------------------- Main ---------------------------------------

if __name__ == "__main__":
    B, T = 2, 8
    input_size, hidden_size, output_size, num_layers = 8, 32, 4, 2

    key = jax.random.PRNGKey(0)
    key, kx = jax.random.split(key)
    x = jax.random.normal(kx, (B, T, input_size), jnp.float32)   # batch_first input

    params = init_params(key, input_size, hidden_size, output_size, num_layers)

    out = simple_rnn_forward(x, params)
    out = jax.block_until_ready(out)

    ref = jax.block_until_ready(simple_rnn_ref(x, params))
    assert out.shape == (B, output_size)
    # Tolerance re-validated for the bf16 recurrence (f32 accumulation kept).
    assert jnp.allclose(out, ref, rtol=3e-2, atol=3e-2), "mismatch vs JAX reference"

    print("KERNEL_OK")
</pallas_src>

<mosaic_0001>
module attributes {stable_mosaic.version = 11 : i64} {
  func.func @kernel(%arg0: memref<128x8xbf16, #tpu.memory_space<vmem>>, %arg1: memref<8x64xbf16, #tpu.memory_space<vmem>>, %arg2: memref<64x64xbf16, #tpu.memory_space<vmem>>, %arg3: memref<1x64xf32, #tpu.memory_space<vmem>>, %arg4: memref<64x64xbf16, #tpu.memory_space<vmem>>, %arg5: memref<64x64xbf16, #tpu.memory_space<vmem>>, %arg6: memref<1x64xf32, #tpu.memory_space<vmem>>, %arg7: memref<64x4xf32, #tpu.memory_space<vmem>>, %arg8: memref<1x4xf32, #tpu.memory_space<vmem>>, %arg9: memref<16x4xf32, #tpu.memory_space<vmem>>, %arg10: memref<128x64xbf16, #tpu.memory_space<vmem>>, %arg11: memref<128x64xbf16, #tpu.memory_space<vmem>>) attributes {dimension_semantics = [], scalar_prefetch = 0 : i64, scratch_operands = 2 : i64, tpu.core_type = #tpu.core_type<tc>} {
    %c0 = arith.constant 0 : index
    %c0_0 = arith.constant 0 : index
    %0 = vector.load %arg0[%c0, %c0_0] : memref<128x8xbf16, #tpu.memory_space<vmem>>, vector<128x8xbf16>
    %c0_1 = arith.constant 0 : index
    %c0_2 = arith.constant 0 : index
    %1 = vector.load %arg1[%c0_1, %c0_2] : memref<8x64xbf16, #tpu.memory_space<vmem>>, vector<8x64xbf16>
    %cst = arith.constant dense<0.000000e+00> : vector<128x64xf32>
    %2 = tpu.matmul %0, %1, %cst {dimension_numbers = #tpu.dot_dimension_numbers<[1], [0], [0], [1], [0, 0, 1, 1], [], []>} : vector<128x8xbf16>, vector<8x64xbf16>, vector<128x64xf32> -> vector<128x64xf32>
    %c0_3 = arith.constant 0 : index
    %c0_4 = arith.constant 0 : index
    %3 = vector.load %arg3[%c0_3, %c0_4] : memref<1x64xf32, #tpu.memory_space<vmem>>, vector<1x64xf32>
    %4 = vector.broadcast %3 : vector<1x64xf32> to vector<128x64xf32>
    %5 = arith.addf %2, %4 : vector<128x64xf32>
    %6 = arith.truncf %5 : vector<128x64xf32> to vector<128x64xbf16>
    %c0_5 = arith.constant 0 : index
    %c0_6 = arith.constant 0 : index
    %7 = vector.load %arg11[%c0_5, %c0_6] : memref<128x64xbf16, #tpu.memory_space<vmem>>, vector<128x64xbf16>
    tpu.vector_store %arg11[%c0_5, %c0_6], %6 {strides = array<i32>} : memref<128x64xbf16, #tpu.memory_space<vmem>>, vector<128x64xbf16>,
    %c0_7 = arith.constant 0 : index
    %c0_8 = arith.constant 0 : index
    %8 = vector.load %arg2[%c0_7, %c0_8] : memref<64x64xbf16, #tpu.memory_space<vmem>>, vector<64x64xbf16>
    %cst_9 = arith.constant 0.000000e+00 : f32
    %9 = vector.broadcast %cst_9 : f32 to vector<16x64xf32>
    %c0_i32 = arith.constant 0 : i32
    %c16_i32 = arith.constant 16 : i32
    %10 = arith.muli %c0_i32, %c16_i32 : i32
    %11 = tpu.assume_multiple %10, 16 : i32
    %c7_i32 = arith.constant 7 : i32
    %12 = arith.subi %c7_i32, %c0_i32 : i32
    %c16_i32_10 = arith.constant 16 : i32
    %13 = arith.muli %12, %c16_i32_10 : i32
    %14 = tpu.assume_multiple %13, 16 : i32
    %15 = arith.index_cast %11 : i32 to index
    %c0_11 = arith.constant 0 : index
    %16 = vector.load %arg11[%15, %c0_11] : memref<128x64xbf16, #tpu.memory_space<vmem>>, vector<16x32xbf16>
    %17 = arith.index_cast %14 : i32 to index
    %c32 = arith.constant 32 : index
    %18 = vector.load %arg11[%17, %c32] : memref<128x64xbf16, #tpu.memory_space<vmem>>, vector<16x32xbf16>
    %19 = tpu.concatenate %16, %18 in 1 : vector<16x32xbf16>, vector<16x32xbf16> -> vector<16x64xbf16>
    %20 = arith.extf %19 : vector<16x64xbf16> to vector<16x64xf32>
    %21 = arith.truncf %9 : vector<16x64xf32> to vector<16x64xbf16>
    %cst_12 = arith.constant dense<0.000000e+00> : vector<16x64xf32>
    %22 = tpu.matmul %21, %8, %cst_12 {dimension_numbers = #tpu.dot_dimension_numbers<[1], [0], [0], [1], [0, 0, 1, 1], [], []>} : vector<16x64xbf16>, vector<64x64xbf16>, vector<16x64xf32> -> vector<16x64xf32>
    %23 = arith.addf %20, %22 : vector<16x64xf32>
    %24 = math.tanh %23 : vector<16x64xf32>
    %25 = arith.truncf %24 : vector<16x64xf32> to vector<16x64xbf16>
    %26 = vector.extract_strided_slice %25 {offsets = [0, 0], sizes = [16, 32], strides = [1, 1]} : vector<16x64xbf16> to vector<16x32xbf16>
    %27 = arith.index_cast %11 : i32 to index
    %c0_13 = arith.constant 0 : index
    %28 = vector.load %arg10[%27, %c0_13] : memref<128x64xbf16, #tpu.memory_space<vmem>>, vector<16x32xbf16>
    tpu.vector_store %arg10[%27, %c0_13], %26 {strides = array<i32>} : memref<128x64xbf16, #tpu.memory_space<vmem>>, vector<16x32xbf16>,
    %29 = vector.extract_strided_slice %25 {offsets = [0, 32], sizes = [16, 32], strides = [1, 1]} : vector<16x64xbf16> to vector<16x32xbf16>
    %30 = arith.index_cast %14 : i32 to index
    %c32_14 = arith.constant 32 : index
    %31 = vector.load %arg10[%30, %c32_14] : memref<128x64xbf16, #tpu.memory_space<vmem>>, vector<16x32xbf16>
    tpu.vector_store %arg10[%30, %c32_14], %29 {strides = array<i32>} : memref<128x64xbf16, #tpu.memory_space<vmem>>, vector<16x32xbf16>,
    %c1_i32 = arith.constant 1 : i32
    %c16_i32_15 = arith.constant 16 : i32
    %32 = arith.muli %c1_i32, %c16_i32_15 : i32
    %33 = tpu.assume_multiple %32, 16 : i32
    %c7_i32_16 = arith.constant 7 : i32
    %34 = arith.subi %c7_i32_16, %c1_i32 : i32
    %c16_i32_17 = arith.constant 16 : i32
    %35 = arith.muli %34, %c16_i32_17 : i32
    %36 = tpu.assume_multiple %35, 16 : i32
    %37 = arith.index_cast %33 : i32 to index
    %c0_18 = arith.constant 0 : index
    %38 = vector.load %arg11[%37, %c0_18] : memref<128x64xbf16, #tpu.memory_space<vmem>>, vector<16x32xbf16>
    %39 = arith.index_cast %36 : i32 to index
    %c32_19 = arith.constant 32 : index
    %40 = vector.load %arg11[%39, %c32_19] : memref<128x64xbf16, #tpu.memory_space<vmem>>, vector<16x32xbf16>
    %41 = tpu.concatenate %38, %40 in 1 : vector<16x32xbf16>, vector<16x32xbf16> -> vector<16x64xbf16>
    %42 = arith.extf %41 : vector<16x64xbf16> to vector<16x64xf32>
    %43 = arith.truncf %24 : vector<16x64xf32> to vector<16x64xbf16>
    %cst_20 = arith.constant dense<0.000000e+00> : vector<16x64xf32>
    %44 = tpu.matmul %43, %8, %cst_20 {dimension_numbers = #tpu.dot_dimension_numbers<[1], [0], [0], [1], [0, 0, 1, 1], [], []>} : vector<16x64xbf16>, vector<64x64xbf16>, vector<16x64xf32> -> vector<16x64xf32>
    %45 = arith.addf %42, %44 : vector<16x64xf32>
    %46 = math.tanh %45 : vector<16x64xf32>
    %47 = arith.truncf %46 : vector<16x64xf32> to vector<16x64xbf16>
    %48 = vector.extract_strided_slice %47 {offsets = [0, 0], sizes = [16, 32], strides = [1, 1]} : vector<16x64xbf16> to vector<16x32xbf16>
    %49 = arith.index_cast %33 : i32 to index
    %c0_21 = arith.constant 0 : index
    %50 = vector.load %arg10[%49, %c0_21] : memref<128x64xbf16, #tpu.memory_space<vmem>>, vector<16x32xbf16>
    tpu.vector_store %arg10[%49, %c0_21], %48 {strides = array<i32>} : memref<128x64xbf16, #tpu.memory_space<vmem>>, vector<16x32xbf16>,
    %51 = vector.extract_strided_slice %47 {offsets = [0, 32], sizes = [16, 32], strides = [1, 1]} : vector<16x64xbf16> to vector<16x32xbf16>
    %52 = arith.index_cast %36 : i32 to index
    %c32_22 = arith.constant 32 : index
    %53 = vector.load %arg10[%52, %c32_22] : memref<128x64xbf16, #tpu.memory_space<vmem>>, vector<16x32xbf16>
    tpu.vector_store %arg10[%52, %c32_22], %51 {strides = array<i32>} : memref<128x64xbf16, #tpu.memory_space<vmem>>, vector<16x32xbf16>,
    %c2_i32 = arith.constant 2 : i32
    %c16_i32_23 = arith.constant 16 : i32
    %54 = arith.muli %c2_i32, %c16_i32_23 : i32
    %55 = tpu.assume_multiple %54, 16 : i32
    %c7_i32_24 = arith.constant 7 : i32
    %56 = arith.subi %c7_i32_24, %c2_i32 : i32
    %c16_i32_25 = arith.constant 16 : i32
    %57 = arith.muli %56, %c16_i32_25 : i32
    %58 = tpu.assume_multiple %57, 16 : i32
    %59 = arith.index_cast %55 : i32 to index
    %c0_26 = arith.constant 0 : index
    %60 = vector.load %arg11[%59, %c0_26] : memref<128x64xbf16, #tpu.memory_space<vmem>>, vector<16x32xbf16>
    %61 = arith.index_cast %58 : i32 to index
    %c32_27 = arith.constant 32 : index
    %62 = vector.load %arg11[%61, %c32_27] : memref<128x64xbf16, #tpu.memory_space<vmem>>, vector<16x32xbf16>
    %63 = tpu.concatenate %60, %62 in 1 : vector<16x32xbf16>, vector<16x32xbf16> -> vector<16x64xbf16>
    %64 = arith.extf %63 : vector<16x64xbf16> to vector<16x64xf32>
    %65 = arith.truncf %46 : vector<16x64xf32> to vector<16x64xbf16>
    %cst_28 = arith.constant dense<0.000000e+00> : vector<16x64xf32>
    %66 = tpu.matmul %65, %8, %cst_28 {dimension_numbers = #tpu.dot_dimension_numbers<[1], [0], [0], [1], [0, 0, 1, 1], [], []>} : vector<16x64xbf16>, vector<64x64xbf16>, vector<16x64xf32> -> vector<16x64xf32>
    %67 = arith.addf %64, %66 : vector<16x64xf32>
    %68 = math.tanh %67 : vector<16x64xf32>
    %69 = arith.truncf %68 : vector<16x64xf32> to vector<16x64xbf16>
    %70 = vector.extract_strided_slice %69 {offsets = [0, 0], sizes = [16, 32], strides = [1, 1]} : vector<16x64xbf16> to vector<16x32xbf16>
    %71 = arith.index_cast %55 : i32 to index
    %c0_29 = arith.constant 0 : index
    %72 = vector.load %arg10[%71, %c0_29] : memref<128x64xbf16, #tpu.memory_space<vmem>>, vector<16x32xbf16>
    tpu.vector_store %arg10[%71, %c0_29], %70 {strides = array<i32>} : memref<128x64xbf16, #tpu.memory_space<vmem>>, vector<16x32xbf16>,
    %73 = vector.extract_strided_slice %69 {offsets = [0, 32], sizes = [16, 32], strides = [1, 1]} : vector<16x64xbf16> to vector<16x32xbf16>
    %74 = arith.index_cast %58 : i32 to index
    %c32_30 = arith.constant 32 : index
    %75 = vector.load %arg10[%74, %c32_30] : memref<128x64xbf16, #tpu.memory_space<vmem>>, vector<16x32xbf16>
    tpu.vector_store %arg10[%74, %c32_30], %73 {strides = array<i32>} : memref<128x64xbf16, #tpu.memory_space<vmem>>, vector<16x32xbf16>,
    %c3_i32 = arith.constant 3 : i32
    %c16_i32_31 = arith.constant 16 : i32
    %76 = arith.muli %c3_i32, %c16_i32_31 : i32
    %77 = tpu.assume_multiple %76, 16 : i32
    %c7_i32_32 = arith.constant 7 : i32
    %78 = arith.subi %c7_i32_32, %c3_i32 : i32
    %c16_i32_33 = arith.constant 16 : i32
    %79 = arith.muli %78, %c16_i32_33 : i32
    %80 = tpu.assume_multiple %79, 16 : i32
    %81 = arith.index_cast %77 : i32 to index
    %c0_34 = arith.constant 0 : index
    %82 = vector.load %arg11[%81, %c0_34] : memref<128x64xbf16, #tpu.memory_space<vmem>>, vector<16x32xbf16>
    %83 = arith.index_cast %80 : i32 to index
    %c32_35 = arith.constant 32 : index
    %84 = vector.load %arg11[%83, %c32_35] : memref<128x64xbf16, #tpu.memory_space<vmem>>, vector<16x32xbf16>
    %85 = tpu.concatenate %82, %84 in 1 : vector<16x32xbf16>, vector<16x32xbf16> -> vector<16x64xbf16>
    %86 = arith.extf %85 : vector<16x64xbf16> to vector<16x64xf32>
    %87 = arith.truncf %68 : vector<16x64xf32> to vector<16x64xbf16>
    %cst_36 = arith.constant dense<0.000000e+00> : vector<16x64xf32>
    %88 = tpu.matmul %87, %8, %cst_36 {dimension_numbers = #tpu.dot_dimension_numbers<[1], [0], [0], [1], [0, 0, 1, 1], [], []>} : vector<16x64xbf16>, vector<64x64xbf16>, vector<16x64xf32> -> vector<16x64xf32>
    %89 = arith.addf %86, %88 : vector<16x64xf32>
    %90 = math.tanh %89 : vector<16x64xf32>
    %91 = arith.truncf %90 : vector<16x64xf32> to vector<16x64xbf16>
    %92 = vector.extract_strided_slice %91 {offsets = [0, 0], sizes = [16, 32], strides = [1, 1]} : vector<16x64xbf16> to vector<16x32xbf16>
    %93 = arith.index_cast %77 : i32 to index
    %c0_37 = arith.constant 0 : index
    %94 = vector.load %arg10[%93, %c0_37] : memref<128x64xbf16, #tpu.memory_space<vmem>>, vector<16x32xbf16>
    tpu.vector_store %arg10[%93, %c0_37], %92 {strides = array<i32>} : memref<128x64xbf16, #tpu.memory_space<vmem>>, vector<16x32xbf16>,
    %95 = vector.extract_strided_slice %91 {offsets = [0, 32], sizes = [16, 32], strides = [1, 1]} : vector<16x64xbf16> to vector<16x32xbf16>
    %96 = arith.index_cast %80 : i32 to index
    %c32_38 = arith.constant 32 : index
    %97 = vector.load %arg10[%96, %c32_38] : memref<128x64xbf16, #tpu.memory_space<vmem>>, vector<16x32xbf16>
    tpu.vector_store %arg10[%96, %c32_38], %95 {strides = array<i32>} : memref<128x64xbf16, #tpu.memory_space<vmem>>, vector<16x32xbf16>,
    %c4_i32 = arith.constant 4 : i32
    %c16_i32_39 = arith.constant 16 : i32
    %98 = arith.muli %c4_i32, %c16_i32_39 : i32
    %99 = tpu.assume_multiple %98, 16 : i32
    %c7_i32_40 = arith.constant 7 : i32
    %100 = arith.subi %c7_i32_40, %c4_i32 : i32
    %c16_i32_41 = arith.constant 16 : i32
    %101 = arith.muli %100, %c16_i32_41 : i32
    %102 = tpu.assume_multiple %101, 16 : i32
    %103 = arith.index_cast %99 : i32 to index
    %c0_42 = arith.constant 0 : index
    %104 = vector.load %arg11[%103, %c0_42] : memref<128x64xbf16, #tpu.memory_space<vmem>>, vector<16x32xbf16>
    %105 = arith.index_cast %102 : i32 to index
    %c32_43 = arith.constant 32 : index
    %106 = vector.load %arg11[%105, %c32_43] : memref<128x64xbf16, #tpu.memory_space<vmem>>, vector<16x32xbf16>
    %107 = tpu.concatenate %104, %106 in 1 : vector<16x32xbf16>, vector<16x32xbf16> -> vector<16x64xbf16>
    %108 = arith.extf %107 : vector<16x64xbf16> to vector<16x64xf32>
    %109 = arith.truncf %90 : vector<16x64xf32> to vector<16x64xbf16>
    %cst_44 = arith.constant dense<0.000000e+00> : vector<16x64xf32>
    %110 = tpu.matmul %109, %8, %cst_44 {dimension_numbers = #tpu.dot_dimension_numbers<[1], [0], [0], [1], [0, 0, 1, 1], [], []>} : vector<16x64xbf16>, vector<64x64xbf16>, vector<16x64xf32> -> vector<16x64xf32>
    %111 = arith.addf %108, %110 : vector<16x64xf32>
    %112 = math.tanh %111 : vector<16x64xf32>
    %113 = arith.truncf %112 : vector<16x64xf32> to vector<16x64xbf16>
    %114 = vector.extract_strided_slice %113 {offsets = [0, 0], sizes = [16, 32], strides = [1, 1]} : vector<16x64xbf16> to vector<16x32xbf16>
    %115 = arith.index_cast %99 : i32 to index
    %c0_45 = arith.constant 0 : index
    %116 = vector.load %arg10[%115, %c0_45] : memref<128x64xbf16, #tpu.memory_space<vmem>>, vector<16x32xbf16>
    tpu.vector_store %arg10[%115, %c0_45], %114 {strides = array<i32>} : memref<128x64xbf16, #tpu.memory_space<vmem>>, vector<16x32xbf16>,
    %117 = vector.extract_strided_slice %113 {offsets = [0, 32], sizes = [16, 32], strides = [1, 1]} : vector<16x64xbf16> to vector<16x32xbf16>
    %118 = arith.index_cast %102 : i32 to index
    %c32_46 = arith.constant 32 : index
    %119 = vector.load %arg10[%118, %c32_46] : memref<128x64xbf16, #tpu.memory_space<vmem>>, vector<16x32xbf16>
    tpu.vector_store %arg10[%118, %c32_46], %117 {strides = array<i32>} : memref<128x64xbf16, #tpu.memory_space<vmem>>, vector<16x32xbf16>,
    %c5_i32 = arith.constant 5 : i32
    %c16_i32_47 = arith.constant 16 : i32
    %120 = arith.muli %c5_i32, %c16_i32_47 : i32
    %121 = tpu.assume_multiple %120, 16 : i32
    %c7_i32_48 = arith.constant 7 : i32
    %122 = arith.subi %c7_i32_48, %c5_i32 : i32
    %c16_i32_49 = arith.constant 16 : i32
    %123 = arith.muli %122, %c16_i32_49 : i32
    %124 = tpu.assume_multiple %123, 16 : i32
    %125 = arith.index_cast %121 : i32 to index
    %c0_50 = arith.constant 0 : index
    %126 = vector.load %arg11[%125, %c0_50] : memref<128x64xbf16, #tpu.memory_space<vmem>>, vector<16x32xbf16>
    %127 = arith.index_cast %124 : i32 to index
    %c32_51 = arith.constant 32 : index
    %128 = vector.load %arg11[%127, %c32_51] : memref<128x64xbf16, #tpu.memory_space<vmem>>, vector<16x32xbf16>
    %129 = tpu.concatenate %126, %128 in 1 : vector<16x32xbf16>, vector<16x32xbf16> -> vector<16x64xbf16>
    %130 = arith.extf %129 : vector<16x64xbf16> to vector<16x64xf32>
    %131 = arith.truncf %112 : vector<16x64xf32> to vector<16x64xbf16>
    %cst_52 = arith.constant dense<0.000000e+00> : vector<16x64xf32>
    %132 = tpu.matmul %131, %8, %cst_52 {dimension_numbers = #tpu.dot_dimension_numbers<[1], [0], [0], [1], [0, 0, 1, 1], [], []>} : vector<16x64xbf16>, vector<64x64xbf16>, vector<16x64xf32> -> vector<16x64xf32>
    %133 = arith.addf %130, %132 : vector<16x64xf32>
    %134 = math.tanh %133 : vector<16x64xf32>
    %135 = arith.truncf %134 : vector<16x64xf32> to vector<16x64xbf16>
    %136 = vector.extract_strided_slice %135 {offsets = [0, 0], sizes = [16, 32], strides = [1, 1]} : vector<16x64xbf16> to vector<16x32xbf16>
    %137 = arith.index_cast %121 : i32 to index
    %c0_53 = arith.constant 0 : index
    %138 = vector.load %arg10[%137, %c0_53] : memref<128x64xbf16, #tpu.memory_space<vmem>>, vector<16x32xbf16>
    tpu.vector_store %arg10[%137, %c0_53], %136 {strides = array<i32>} : memref<128x64xbf16, #tpu.memory_space<vmem>>, vector<16x32xbf16>,
    %139 = vector.extract_strided_slice %135 {offsets = [0, 32], sizes = [16, 32], strides = [1, 1]} : vector<16x64xbf16> to vector<16x32xbf16>
    %140 = arith.index_cast %124 : i32 to index
    %c32_54 = arith.constant 32 : index
    %141 = vector.load %arg10[%140, %c32_54] : memref<128x64xbf16, #tpu.memory_space<vmem>>, vector<16x32xbf16>
    tpu.vector_store %arg10[%140, %c32_54], %139 {strides = array<i32>} : memref<128x64xbf16, #tpu.memory_space<vmem>>, vector<16x32xbf16>,
    %c6_i32 = arith.constant 6 : i32
    %c16_i32_55 = arith.constant 16 : i32
    %142 = arith.muli %c6_i32, %c16_i32_55 : i32
    %143 = tpu.assume_multiple %142, 16 : i32
    %c7_i32_56 = arith.constant 7 : i32
    %144 = arith.subi %c7_i32_56, %c6_i32 : i32
    %c16_i32_57 = arith.constant 16 : i32
    %145 = arith.muli %144, %c16_i32_57 : i32
    %146 = tpu.assume_multiple %145, 16 : i32
    %147 = arith.index_cast %143 : i32 to index
    %c0_58 = arith.constant 0 : index
    %148 = vector.load %arg11[%147, %c0_58] : memref<128x64xbf16, #tpu.memory_space<vmem>>, vector<16x32xbf16>
    %149 = arith.index_cast %146 : i32 to index
    %c32_59 = arith.constant 32 : index
    %150 = vector.load %arg11[%149, %c32_59] : memref<128x64xbf16, #tpu.memory_space<vmem>>, vector<16x32xbf16>
    %151 = tpu.concatenate %148, %150 in 1 : vector<16x32xbf16>, vector<16x32xbf16> -> vector<16x64xbf16>
    %152 = arith.extf %151 : vector<16x64xbf16> to vector<16x64xf32>
    %153 = arith.truncf %134 : vector<16x64xf32> to vector<16x64xbf16>
    %cst_60 = arith.constant dense<0.000000e+00> : vector<16x64xf32>
    %154 = tpu.matmul %153, %8, %cst_60 {dimension_numbers = #tpu.dot_dimension_numbers<[1], [0], [0], [1], [0, 0, 1, 1], [], []>} : vector<16x64xbf16>, vector<64x64xbf16>, vector<16x64xf32> -> vector<16x64xf32>
    %155 = arith.addf %152, %154 : vector<16x64xf32>
    %156 = math.tanh %155 : vector<16x64xf32>
    %157 = arith.truncf %156 : vector<16x64xf32> to vector<16x64xbf16>
    %158 = vector.extract_strided_slice %157 {offsets = [0, 0], sizes = [16, 32], strides = [1, 1]} : vector<16x64xbf16> to vector<16x32xbf16>
    %159 = arith.index_cast %143 : i32 to index
    %c0_61 = arith.constant 0 : index
    %160 = vector.load %arg10[%159, %c0_61] : memref<128x64xbf16, #tpu.memory_space<vmem>>, vector<16x32xbf16>
    tpu.vector_store %arg10[%159, %c0_61], %158 {strides = array<i32>} : memref<128x64xbf16, #tpu.memory_space<vmem>>, vector<16x32xbf16>,
    %161 = vector.extract_strided_slice %157 {offsets = [0, 32], sizes = [16, 32], strides = [1, 1]} : vector<16x64xbf16> to vector<16x32xbf16>
    %162 = arith.index_cast %146 : i32 to index
    %c32_62 = arith.constant 32 : index
    %163 = vector.load %arg10[%162, %c32_62] : memref<128x64xbf16, #tpu.memory_space<vmem>>, vector<16x32xbf16>
    tpu.vector_store %arg10[%162, %c32_62], %161 {strides = array<i32>} : memref<128x64xbf16, #tpu.memory_space<vmem>>, vector<16x32xbf16>,
    %c7_i32_63 = arith.constant 7 : i32
    %c16_i32_64 = arith.constant 16 : i32
    %164 = arith.muli %c7_i32_63, %c16_i32_64 : i32
    %165 = tpu.assume_multiple %164, 16 : i32
    %c7_i32_65 = arith.constant 7 : i32
    %166 = arith.subi %c7_i32_65, %c7_i32_63 : i32
    %c16_i32_66 = arith.constant 16 : i32
    %167 = arith.muli %166, %c16_i32_66 : i32
    %168 = tpu.assume_multiple %167, 16 : i32
    %169 = arith.index_cast %165 : i32 to index
    %c0_67 = arith.constant 0 : index
    %170 = vector.load %arg11[%169, %c0_67] : memref<128x64xbf16, #tpu.memory_space<vmem>>, vector<16x32xbf16>
    %171 = arith.index_cast %168 : i32 to index
    %c32_68 = arith.constant 32 : index
    %172 = vector.load %arg11[%171, %c32_68] : memref<128x64xbf16, #tpu.memory_space<vmem>>, vector<16x32xbf16>
    %173 = tpu.concatenate %170, %172 in 1 : vector<16x32xbf16>, vector<16x32xbf16> -> vector<16x64xbf16>
    %174 = arith.extf %173 : vector<16x64xbf16> to vector<16x64xf32>
    %175 = arith.truncf %156 : vector<16x64xf32> to vector<16x64xbf16>
    %cst_69 = arith.constant dense<0.000000e+00> : vector<16x64xf32>
    %176 = tpu.matmul %175, %8, %cst_69 {dimension_numbers = #tpu.dot_dimension_numbers<[1], [0], [0], [1], [0, 0, 1, 1], [], []>} : vector<16x64xbf16>, vector<64x64xbf16>, vector<16x64xf32> -> vector<16x64xf32>
    %177 = arith.addf %174, %176 : vector<16x64xf32>
    %178 = math.tanh %177 : vector<16x64xf32>
    %179 = arith.truncf %178 : vector<16x64xf32> to vector<16x64xbf16>
    %180 = vector.extract_strided_slice %179 {offsets = [0, 0], sizes = [16, 32], strides = [1, 1]} : vector<16x64xbf16> to vector<16x32xbf16>
    %181 = arith.index_cast %165 : i32 to index
    %c0_70 = arith.constant 0 : index
    %182 = vector.load %arg10[%181, %c0_70] : memref<128x64xbf16, #tpu.memory_space<vmem>>, vector<16x32xbf16>
    tpu.vector_store %arg10[%181, %c0_70], %180 {strides = array<i32>} : memref<128x64xbf16, #tpu.memory_space<vmem>>, vector<16x32xbf16>,
    %183 = vector.extract_strided_slice %179 {offsets = [0, 32], sizes = [16, 32], strides = [1, 1]} : vector<16x64xbf16> to vector<16x32xbf16>
    %184 = arith.index_cast %168 : i32 to index
    %c32_71 = arith.constant 32 : index
    %185 = vector.load %arg10[%184, %c32_71] : memref<128x64xbf16, #tpu.memory_space<vmem>>, vector<16x32xbf16>
    tpu.vector_store %arg10[%184, %c32_71], %183 {strides = array<i32>} : memref<128x64xbf16, #tpu.memory_space<vmem>>, vector<16x32xbf16>,
    %c8_i32 = arith.constant 8 : i32
    %c0_72 = arith.constant 0 : index
    %c0_73 = arith.constant 0 : index
    %186 = vector.load %arg10[%c0_72, %c0_73] : memref<128x64xbf16, #tpu.memory_space<vmem>>, vector<128x64xbf16>
    %c0_74 = arith.constant 0 : index
    %c0_75 = arith.constant 0 : index
    %187 = vector.load %arg4[%c0_74, %c0_75] : memref<64x64xbf16, #tpu.memory_space<vmem>>, vector<64x64xbf16>
    %cst_76 = arith.constant dense<0.000000e+00> : vector<128x64xf32>
    %188 = tpu.matmul %186, %187, %cst_76 {dimension_numbers = #tpu.dot_dimension_numbers<[1], [0], [0], [1], [0, 0, 1, 1], [], []>} : vector<128x64xbf16>, vector<64x64xbf16>, vector<128x64xf32> -> vector<128x64xf32>
    %c0_77 = arith.constant 0 : index
    %c0_78 = arith.constant 0 : index
    %189 = vector.load %arg6[%c0_77, %c0_78] : memref<1x64xf32, #tpu.memory_space<vmem>>, vector<1x64xf32>
    %190 = vector.broadcast %189 : vector<1x64xf32> to vector<128x64xf32>
    %191 = arith.addf %188, %190 : vector<128x64xf32>
    %192 = arith.truncf %191 : vector<128x64xf32> to vector<128x64xbf16>
    %c0_79 = arith.constant 0 : index
    %c0_80 = arith.constant 0 : index
    %193 = vector.load %arg11[%c0_79, %c0_80] : memref<128x64xbf16, #tpu.memory_space<vmem>>, vector<128x64xbf16>
    tpu.vector_store %arg11[%c0_79, %c0_80], %192 {strides = array<i32>} : memref<128x64xbf16, #tpu.memory_space<vmem>>, vector<128x64xbf16>,
    %c0_81 = arith.constant 0 : index
    %c0_82 = arith.constant 0 : index
    %194 = vector.load %arg5[%c0_81, %c0_82] : memref<64x64xbf16, #tpu.memory_space<vmem>>, vector<64x64xbf16>
    %cst_83 = arith.constant 0.000000e+00 : f32
    %195 = vector.broadcast %cst_83 : f32 to vector<16x64xf32>
    %c0_i32_84 = arith.constant 0 : i32
    %c16_i32_85 = arith.constant 16 : i32
    %196 = arith.muli %c0_i32_84, %c16_i32_85 : i32
    %197 = tpu.assume_multiple %196, 16 : i32
    %c7_i32_86 = arith.constant 7 : i32
    %198 = arith.subi %c7_i32_86, %c0_i32_84 : i32
    %c16_i32_87 = arith.constant 16 : i32
    %199 = arith.muli %198, %c16_i32_87 : i32
    %200 = tpu.assume_multiple %199, 16 : i32
    %201 = arith.index_cast %197 : i32 to index
    %c0_88 = arith.constant 0 : index
    %202 = vector.load %arg11[%201, %c0_88] : memref<128x64xbf16, #tpu.memory_space<vmem>>, vector<16x32xbf16>
    %203 = arith.index_cast %200 : i32 to index
    %c32_89 = arith.constant 32 : index
    %204 = vector.load %arg11[%203, %c32_89] : memref<128x64xbf16, #tpu.memory_space<vmem>>, vector<16x32xbf16>
    %205 = tpu.concatenate %202, %204 in 1 : vector<16x32xbf16>, vector<16x32xbf16> -> vector<16x64xbf16>
    %206 = arith.extf %205 : vector<16x64xbf16> to vector<16x64xf32>
    %207 = arith.truncf %195 : vector<16x64xf32> to vector<16x64xbf16>
    %cst_90 = arith.constant dense<0.000000e+00> : vector<16x64xf32>
    %208 = tpu.matmul %207, %194, %cst_90 {dimension_numbers = #tpu.dot_dimension_numbers<[1], [0], [0], [1], [0, 0, 1, 1], [], []>} : vector<16x64xbf16>, vector<64x64xbf16>, vector<16x64xf32> -> vector<16x64xf32>
    %209 = arith.addf %206, %208 : vector<16x64xf32>
    %210 = math.tanh %209 : vector<16x64xf32>
    %211 = arith.truncf %210 : vector<16x64xf32> to vector<16x64xbf16>
    %212 = vector.extract_strided_slice %211 {offsets = [0, 0], sizes = [16, 32], strides = [1, 1]} : vector<16x64xbf16> to vector<16x32xbf16>
    %213 = arith.index_cast %197 : i32 to index
    %c0_91 = arith.constant 0 : index
    %214 = vector.load %arg10[%213, %c0_91] : memref<128x64xbf16, #tpu.memory_space<vmem>>, vector<16x32xbf16>
    tpu.vector_store %arg10[%213, %c0_91], %212 {strides = array<i32>} : memref<128x64xbf16, #tpu.memory_space<vmem>>, vector<16x32xbf16>,
    %215 = vector.extract_strided_slice %211 {offsets = [0, 32], sizes = [16, 32], strides = [1, 1]} : vector<16x64xbf16> to vector<16x32xbf16>
    %216 = arith.index_cast %200 : i32 to index
    %c32_92 = arith.constant 32 : index
    %217 = vector.load %arg10[%216, %c32_92] : memref<128x64xbf16, #tpu.memory_space<vmem>>, vector<16x32xbf16>
    tpu.vector_store %arg10[%216, %c32_92], %215 {strides = array<i32>} : memref<128x64xbf16, #tpu.memory_space<vmem>>, vector<16x32xbf16>,
    %c1_i32_93 = arith.constant 1 : i32
    %c16_i32_94 = arith.constant 16 : i32
    %218 = arith.muli %c1_i32_93, %c16_i32_94 : i32
    %219 = tpu.assume_multiple %218, 16 : i32
    %c7_i32_95 = arith.constant 7 : i32
    %220 = arith.subi %c7_i32_95, %c1_i32_93 : i32
    %c16_i32_96 = arith.constant 16 : i32
    %221 = arith.muli %220, %c16_i32_96 : i32
    %222 = tpu.assume_multiple %221, 16 : i32
    %223 = arith.index_cast %219 : i32 to index
    %c0_97 = arith.constant 0 : index
    %224 = vector.load %arg11[%223, %c0_97] : memref<128x64xbf16, #tpu.memory_space<vmem>>, vector<16x32xbf16>
    %225 = arith.index_cast %222 : i32 to index
    %c32_98 = arith.constant 32 : index
    %226 = vector.load %arg11[%225, %c32_98] : memref<128x64xbf16, #tpu.memory_space<vmem>>, vector<16x32xbf16>
    %227 = tpu.concatenate %224, %226 in 1 : vector<16x32xbf16>, vector<16x32xbf16> -> vector<16x64xbf16>
    %228 = arith.extf %227 : vector<16x64xbf16> to vector<16x64xf32>
    %229 = arith.truncf %210 : vector<16x64xf32> to vector<16x64xbf16>
    %cst_99 = arith.constant dense<0.000000e+00> : vector<16x64xf32>
    %230 = tpu.matmul %229, %194, %cst_99 {dimension_numbers = #tpu.dot_dimension_numbers<[1], [0], [0], [1], [0, 0, 1, 1], [], []>} : vector<16x64xbf16>, vector<64x64xbf16>, vector<16x64xf32> -> vector<16x64xf32>
    %231 = arith.addf %228, %230 : vector<16x64xf32>
    %232 = math.tanh %231 : vector<16x64xf32>
    %233 = arith.truncf %232 : vector<16x64xf32> to vector<16x64xbf16>
    %234 = vector.extract_strided_slice %233 {offsets = [0, 0], sizes = [16, 32], strides = [1, 1]} : vector<16x64xbf16> to vector<16x32xbf16>
    %235 = arith.index_cast %219 : i32 to index
    %c0_100 = arith.constant 0 : index
    %236 = vector.load %arg10[%235, %c0_100] : memref<128x64xbf16, #tpu.memory_space<vmem>>, vector<16x32xbf16>
    tpu.vector_store %arg10[%235, %c0_100], %234 {strides = array<i32>} : memref<128x64xbf16, #tpu.memory_space<vmem>>, vector<16x32xbf16>,
    %237 = vector.extract_strided_slice %233 {offsets = [0, 32], sizes = [16, 32], strides = [1, 1]} : vector<16x64xbf16> to vector<16x32xbf16>
    %238 = arith.index_cast %222 : i32 to index
    %c32_101 = arith.constant 32 : index
    %239 = vector.load %arg10[%238, %c32_101] : memref<128x64xbf16, #tpu.memory_space<vmem>>, vector<16x32xbf16>
    tpu.vector_store %arg10[%238, %c32_101], %237 {strides = array<i32>} : memref<128x64xbf16, #tpu.memory_space<vmem>>, vector<16x32xbf16>,
    %c2_i32_102 = arith.constant 2 : i32
    %c16_i32_103 = arith.constant 16 : i32
    %240 = arith.muli %c2_i32_102, %c16_i32_103 : i32
    %241 = tpu.assume_multiple %240, 16 : i32
    %c7_i32_104 = arith.constant 7 : i32
    %242 = arith.subi %c7_i32_104, %c2_i32_102 : i32
    %c16_i32_105 = arith.constant 16 : i32
    %243 = arith.muli %242, %c16_i32_105 : i32
    %244 = tpu.assume_multiple %243, 16 : i32
    %245 = arith.index_cast %241 : i32 to index
    %c0_106 = arith.constant 0 : index
    %246 = vector.load %arg11[%245, %c0_106] : memref<128x64xbf16, #tpu.memory_space<vmem>>, vector<16x32xbf16>
    %247 = arith.index_cast %244 : i32 to index
    %c32_107 = arith.constant 32 : index
    %248 = vector.load %arg11[%247, %c32_107] : memref<128x64xbf16, #tpu.memory_space<vmem>>, vector<16x32xbf16>
    %249 = tpu.concatenate %246, %248 in 1 : vector<16x32xbf16>, vector<16x32xbf16> -> vector<16x64xbf16>
    %250 = arith.extf %249 : vector<16x64xbf16> to vector<16x64xf32>
    %251 = arith.truncf %232 : vector<16x64xf32> to vector<16x64xbf16>
    %cst_108 = arith.constant dense<0.000000e+00> : vector<16x64xf32>
    %252 = tpu.matmul %251, %194, %cst_108 {dimension_numbers = #tpu.dot_dimension_numbers<[1], [0], [0], [1], [0, 0, 1, 1], [], []>} : vector<16x64xbf16>, vector<64x64xbf16>, vector<16x64xf32> -> vector<16x64xf32>
    %253 = arith.addf %250, %252 : vector<16x64xf32>
    %254 = math.tanh %253 : vector<16x64xf32>
    %255 = arith.truncf %254 : vector<16x64xf32> to vector<16x64xbf16>
    %256 = vector.extract_strided_slice %255 {offsets = [0, 0], sizes = [16, 32], strides = [1, 1]} : vector<16x64xbf16> to vector<16x32xbf16>
    %257 = arith.index_cast %241 : i32 to index
    %c0_109 = arith.constant 0 : index
    %258 = vector.load %arg10[%257, %c0_109] : memref<128x64xbf16, #tpu.memory_space<vmem>>, vector<16x32xbf16>
    tpu.vector_store %arg10[%257, %c0_109], %256 {strides = array<i32>} : memref<128x64xbf16, #tpu.memory_space<vmem>>, vector<16x32xbf16>,
    %259 = vector.extract_strided_slice %255 {offsets = [0, 32], sizes = [16, 32], strides = [1, 1]} : vector<16x64xbf16> to vector<16x32xbf16>
    %260 = arith.index_cast %244 : i32 to index
    %c32_110 = arith.constant 32 : index
    %261 = vector.load %arg10[%260, %c32_110] : memref<128x64xbf16, #tpu.memory_space<vmem>>, vector<16x32xbf16>
    tpu.vector_store %arg10[%260, %c32_110], %259 {strides = array<i32>} : memref<128x64xbf16, #tpu.memory_space<vmem>>, vector<16x32xbf16>,
    %c3_i32_111 = arith.constant 3 : i32
    %c16_i32_112 = arith.constant 16 : i32
    %262 = arith.muli %c3_i32_111, %c16_i32_112 : i32
    %263 = tpu.assume_multiple %262, 16 : i32
    %c7_i32_113 = arith.constant 7 : i32
    %264 = arith.subi %c7_i32_113, %c3_i32_111 : i32
    %c16_i32_114 = arith.constant 16 : i32
    %265 = arith.muli %264, %c16_i32_114 : i32
    %266 = tpu.assume_multiple %265, 16 : i32
    %267 = arith.index_cast %263 : i32 to index
    %c0_115 = arith.constant 0 : index
    %268 = vector.load %arg11[%267, %c0_115] : memref<128x64xbf16, #tpu.memory_space<vmem>>, vector<16x32xbf16>
    %269 = arith.index_cast %266 : i32 to index
    %c32_116 = arith.constant 32 : index
    %270 = vector.load %arg11[%269, %c32_116] : memref<128x64xbf16, #tpu.memory_space<vmem>>, vector<16x32xbf16>
    %271 = tpu.concatenate %268, %270 in 1 : vector<16x32xbf16>, vector<16x32xbf16> -> vector<16x64xbf16>
    %272 = arith.extf %271 : vector<16x64xbf16> to vector<16x64xf32>
    %273 = arith.truncf %254 : vector<16x64xf32> to vector<16x64xbf16>
    %cst_117 = arith.constant dense<0.000000e+00> : vector<16x64xf32>
    %274 = tpu.matmul %273, %194, %cst_117 {dimension_numbers = #tpu.dot_dimension_numbers<[1], [0], [0], [1], [0, 0, 1, 1], [], []>} : vector<16x64xbf16>, vector<64x64xbf16>, vector<16x64xf32> -> vector<16x64xf32>
    %275 = arith.addf %272, %274 : vector<16x64xf32>
    %276 = math.tanh %275 : vector<16x64xf32>
    %277 = arith.truncf %276 : vector<16x64xf32> to vector<16x64xbf16>
    %278 = vector.extract_strided_slice %277 {offsets = [0, 0], sizes = [16, 32], strides = [1, 1]} : vector<16x64xbf16> to vector<16x32xbf16>
    %279 = arith.index_cast %263 : i32 to index
    %c0_118 = arith.constant 0 : index
    %280 = vector.load %arg10[%279, %c0_118] : memref<128x64xbf16, #tpu.memory_space<vmem>>, vector<16x32xbf16>
    tpu.vector_store %arg10[%279, %c0_118], %278 {strides = array<i32>} : memref<128x64xbf16, #tpu.memory_space<vmem>>, vector<16x32xbf16>,
    %281 = vector.extract_strided_slice %277 {offsets = [0, 32], sizes = [16, 32], strides = [1, 1]} : vector<16x64xbf16> to vector<16x32xbf16>
    %282 = arith.index_cast %266 : i32 to index
    %c32_119 = arith.constant 32 : index
    %283 = vector.load %arg10[%282, %c32_119] : memref<128x64xbf16, #tpu.memory_space<vmem>>, vector<16x32xbf16>
    tpu.vector_store %arg10[%282, %c32_119], %281 {strides = array<i32>} : memref<128x64xbf16, #tpu.memory_space<vmem>>, vector<16x32xbf16>,
    %c4_i32_120 = arith.constant 4 : i32
    %c16_i32_121 = arith.constant 16 : i32
    %284 = arith.muli %c4_i32_120, %c16_i32_121 : i32
    %285 = tpu.assume_multiple %284, 16 : i32
    %c7_i32_122 = arith.constant 7 : i32
    %286 = arith.subi %c7_i32_122, %c4_i32_120 : i32
    %c16_i32_123 = arith.constant 16 : i32
    %287 = arith.muli %286, %c16_i32_123 : i32
    %288 = tpu.assume_multiple %287, 16 : i32
    %289 = arith.index_cast %285 : i32 to index
    %c0_124 = arith.constant 0 : index
    %290 = vector.load %arg11[%289, %c0_124] : memref<128x64xbf16, #tpu.memory_space<vmem>>, vector<16x32xbf16>
    %291 = arith.index_cast %288 : i32 to index
    %c32_125 = arith.constant 32 : index
    %292 = vector.load %arg11[%291, %c32_125] : memref<128x64xbf16, #tpu.memory_space<vmem>>, vector<16x32xbf16>
    %293 = tpu.concatenate %290, %292 in 1 : vector<16x32xbf16>, vector<16x32xbf16> -> vector<16x64xbf16>
    %294 = arith.extf %293 : vector<16x64xbf16> to vector<16x64xf32>
    %295 = arith.truncf %276 : vector<16x64xf32> to vector<16x64xbf16>
    %cst_126 = arith.constant dense<0.000000e+00> : vector<16x64xf32>
    %296 = tpu.matmul %295, %194, %cst_126 {dimension_numbers = #tpu.dot_dimension_numbers<[1], [0], [0], [1], [0, 0, 1, 1], [], []>} : vector<16x64xbf16>, vector<64x64xbf16>, vector<16x64xf32> -> vector<16x64xf32>
    %297 = arith.addf %294, %296 : vector<16x64xf32>
    %298 = math.tanh %297 : vector<16x64xf32>
    %299 = arith.truncf %298 : vector<16x64xf32> to vector<16x64xbf16>
    %300 = vector.extract_strided_slice %299 {offsets = [0, 0], sizes = [16, 32], strides = [1, 1]} : vector<16x64xbf16> to vector<16x32xbf16>
    %301 = arith.index_cast %285 : i32 to index
    %c0_127 = arith.constant 0 : index
    %302 = vector.load %arg10[%301, %c0_127] : memref<128x64xbf16, #tpu.memory_space<vmem>>, vector<16x32xbf16>
    tpu.vector_store %arg10[%301, %c0_127], %300 {strides = array<i32>} : memref<128x64xbf16, #tpu.memory_space<vmem>>, vector<16x32xbf16>,
    %303 = vector.extract_strided_slice %299 {offsets = [0, 32], sizes = [16, 32], strides = [1, 1]} : vector<16x64xbf16> to vector<16x32xbf16>
    %304 = arith.index_cast %288 : i32 to index
    %c32_128 = arith.constant 32 : index
    %305 = vector.load %arg10[%304, %c32_128] : memref<128x64xbf16, #tpu.memory_space<vmem>>, vector<16x32xbf16>
    tpu.vector_store %arg10[%304, %c32_128], %303 {strides = array<i32>} : memref<128x64xbf16, #tpu.memory_space<vmem>>, vector<16x32xbf16>,
    %c5_i32_129 = arith.constant 5 : i32
    %c16_i32_130 = arith.constant 16 : i32
    %306 = arith.muli %c5_i32_129, %c16_i32_130 : i32
    %307 = tpu.assume_multiple %306, 16 : i32
    %c7_i32_131 = arith.constant 7 : i32
    %308 = arith.subi %c7_i32_131, %c5_i32_129 : i32
    %c16_i32_132 = arith.constant 16 : i32
    %309 = arith.muli %308, %c16_i32_132 : i32
    %310 = tpu.assume_multiple %309, 16 : i32
    %311 = arith.index_cast %307 : i32 to index
    %c0_133 = arith.constant 0 : index
    %312 = vector.load %arg11[%311, %c0_133] : memref<128x64xbf16, #tpu.memory_space<vmem>>, vector<16x32xbf16>
    %313 = arith.index_cast %310 : i32 to index
    %c32_134 = arith.constant 32 : index
    %314 = vector.load %arg11[%313, %c32_134] : memref<128x64xbf16, #tpu.memory_space<vmem>>, vector<16x32xbf16>
    %315 = tpu.concatenate %312, %314 in 1 : vector<16x32xbf16>, vector<16x32xbf16> -> vector<16x64xbf16>
    %316 = arith.extf %315 : vector<16x64xbf16> to vector<16x64xf32>
    %317 = arith.truncf %298 : vector<16x64xf32> to vector<16x64xbf16>
    %cst_135 = arith.constant dense<0.000000e+00> : vector<16x64xf32>
    %318 = tpu.matmul %317, %194, %cst_135 {dimension_numbers = #tpu.dot_dimension_numbers<[1], [0], [0], [1], [0, 0, 1, 1], [], []>} : vector<16x64xbf16>, vector<64x64xbf16>, vector<16x64xf32> -> vector<16x64xf32>
    %319 = arith.addf %316, %318 : vector<16x64xf32>
    %320 = math.tanh %319 : vector<16x64xf32>
    %321 = arith.truncf %320 : vector<16x64xf32> to vector<16x64xbf16>
    %322 = vector.extract_strided_slice %321 {offsets = [0, 0], sizes = [16, 32], strides = [1, 1]} : vector<16x64xbf16> to vector<16x32xbf16>
    %323 = arith.index_cast %307 : i32 to index
    %c0_136 = arith.constant 0 : index
    %324 = vector.load %arg10[%323, %c0_136] : memref<128x64xbf16, #tpu.memory_space<vmem>>, vector<16x32xbf16>
    tpu.vector_store %arg10[%323, %c0_136], %322 {strides = array<i32>} : memref<128x64xbf16, #tpu.memory_space<vmem>>, vector<16x32xbf16>,
    %325 = vector.extract_strided_slice %321 {offsets = [0, 32], sizes = [16, 32], strides = [1, 1]} : vector<16x64xbf16> to vector<16x32xbf16>
    %326 = arith.index_cast %310 : i32 to index
    %c32_137 = arith.constant 32 : index
    %327 = vector.load %arg10[%326, %c32_137] : memref<128x64xbf16, #tpu.memory_space<vmem>>, vector<16x32xbf16>
    tpu.vector_store %arg10[%326, %c32_137], %325 {strides = array<i32>} : memref<128x64xbf16, #tpu.memory_space<vmem>>, vector<16x32xbf16>,
    %c6_i32_138 = arith.constant 6 : i32
    %c16_i32_139 = arith.constant 16 : i32
    %328 = arith.muli %c6_i32_138, %c16_i32_139 : i32
    %329 = tpu.assume_multiple %328, 16 : i32
    %c7_i32_140 = arith.constant 7 : i32
    %330 = arith.subi %c7_i32_140, %c6_i32_138 : i32
    %c16_i32_141 = arith.constant 16 : i32
    %331 = arith.muli %330, %c16_i32_141 : i32
    %332 = tpu.assume_multiple %331, 16 : i32
    %333 = arith.index_cast %329 : i32 to index
    %c0_142 = arith.constant 0 : index
    %334 = vector.load %arg11[%333, %c0_142] : memref<128x64xbf16, #tpu.memory_space<vmem>>, vector<16x32xbf16>
    %335 = arith.index_cast %332 : i32 to index
    %c32_143 = arith.constant 32 : index
    %336 = vector.load %arg11[%335, %c32_143] : memref<128x64xbf16, #tpu.memory_space<vmem>>, vector<16x32xbf16>
    %337 = tpu.concatenate %334, %336 in 1 : vector<16x32xbf16>, vector<16x32xbf16> -> vector<16x64xbf16>
    %338 = arith.extf %337 : vector<16x64xbf16> to vector<16x64xf32>
    %339 = arith.truncf %320 : vector<16x64xf32> to vector<16x64xbf16>
    %cst_144 = arith.constant dense<0.000000e+00> : vector<16x64xf32>
    %340 = tpu.matmul %339, %194, %cst_144 {dimension_numbers = #tpu.dot_dimension_numbers<[1], [0], [0], [1], [0, 0, 1, 1], [], []>} : vector<16x64xbf16>, vector<64x64xbf16>, vector<16x64xf32> -> vector<16x64xf32>
    %341 = arith.addf %338, %340 : vector<16x64xf32>
    %342 = math.tanh %341 : vector<16x64xf32>
    %343 = arith.truncf %342 : vector<16x64xf32> to vector<16x64xbf16>
    %344 = vector.extract_strided_slice %343 {offsets = [0, 0], sizes = [16, 32], strides = [1, 1]} : vector<16x64xbf16> to vector<16x32xbf16>
    %345 = arith.index_cast %329 : i32 to index
    %c0_145 = arith.constant 0 : index
    %346 = vector.load %arg10[%345, %c0_145] : memref<128x64xbf16, #tpu.memory_space<vmem>>, vector<16x32xbf16>
    tpu.vector_store %arg10[%345, %c0_145], %344 {strides = array<i32>} : memref<128x64xbf16, #tpu.memory_space<vmem>>, vector<16x32xbf16>,
    %347 = vector.extract_strided_slice %343 {offsets = [0, 32], sizes = [16, 32], strides = [1, 1]} : vector<16x64xbf16> to vector<16x32xbf16>
    %348 = arith.index_cast %332 : i32 to index
    %c32_146 = arith.constant 32 : index
    %349 = vector.load %arg10[%348, %c32_146] : memref<128x64xbf16, #tpu.memory_space<vmem>>, vector<16x32xbf16>
    tpu.vector_store %arg10[%348, %c32_146], %347 {strides = array<i32>} : memref<128x64xbf16, #tpu.memory_space<vmem>>, vector<16x32xbf16>,
    %c7_i32_147 = arith.constant 7 : i32
    %c16_i32_148 = arith.constant 16 : i32
    %350 = arith.muli %c7_i32_147, %c16_i32_148 : i32
    %351 = tpu.assume_multiple %350, 16 : i32
    %c7_i32_149 = arith.constant 7 : i32
    %352 = arith.subi %c7_i32_149, %c7_i32_147 : i32
    %c16_i32_150 = arith.constant 16 : i32
    %353 = arith.muli %352, %c16_i32_150 : i32
    %354 = tpu.assume_multiple %353, 16 : i32
    %355 = arith.index_cast %351 : i32 to index
    %c0_151 = arith.constant 0 : index
    %356 = vector.load %arg11[%355, %c0_151] : memref<128x64xbf16, #tpu.memory_space<vmem>>, vector<16x32xbf16>
    %357 = arith.index_cast %354 : i32 to index
    %c32_152 = arith.constant 32 : index
    %358 = vector.load %arg11[%357, %c32_152] : memref<128x64xbf16, #tpu.memory_space<vmem>>, vector<16x32xbf16>
    %359 = tpu.concatenate %356, %358 in 1 : vector<16x32xbf16>, vector<16x32xbf16> -> vector<16x64xbf16>
    %360 = arith.extf %359 : vector<16x64xbf16> to vector<16x64xf32>
    %361 = arith.truncf %342 : vector<16x64xf32> to vector<16x64xbf16>
    %cst_153 = arith.constant dense<0.000000e+00> : vector<16x64xf32>
    %362 = tpu.matmul %361, %194, %cst_153 {dimension_numbers = #tpu.dot_dimension_numbers<[1], [0], [0], [1], [0, 0, 1, 1], [], []>} : vector<16x64xbf16>, vector<64x64xbf16>, vector<16x64xf32> -> vector<16x64xf32>
    %363 = arith.addf %360, %362 : vector<16x64xf32>
    %364 = math.tanh %363 : vector<16x64xf32>
    %365 = arith.truncf %364 : vector<16x64xf32> to vector<16x64xbf16>
    %366 = vector.extract_strided_slice %365 {offsets = [0, 0], sizes = [16, 32], strides = [1, 1]} : vector<16x64xbf16> to vector<16x32xbf16>
    %367 = arith.index_cast %351 : i32 to index
    %c0_154 = arith.constant 0 : index
    %368 = vector.load %arg10[%367, %c0_154] : memref<128x64xbf16, #tpu.memory_space<vmem>>, vector<16x32xbf16>
    tpu.vector_store %arg10[%367, %c0_154], %366 {strides = array<i32>} : memref<128x64xbf16, #tpu.memory_space<vmem>>, vector<16x32xbf16>,
    %369 = vector.extract_strided_slice %365 {offsets = [0, 32], sizes = [16, 32], strides = [1, 1]} : vector<16x64xbf16> to vector<16x32xbf16>
    %370 = arith.index_cast %354 : i32 to index
    %c32_155 = arith.constant 32 : index
    %371 = vector.load %arg10[%370, %c32_155] : memref<128x64xbf16, #tpu.memory_space<vmem>>, vector<16x32xbf16>
    tpu.vector_store %arg10[%370, %c32_155], %369 {strides = array<i32>} : memref<128x64xbf16, #tpu.memory_space<vmem>>, vector<16x32xbf16>,
    %c8_i32_156 = arith.constant 8 : i32
    %c112 = arith.constant 112 : index
    %c0_157 = arith.constant 0 : index
    %372 = vector.load %arg10[%c112, %c0_157] : memref<128x64xbf16, #tpu.memory_space<vmem>>, vector<16x64xbf16>
    %373 = arith.extf %372 : vector<16x64xbf16> to vector<16x64xf32>
    %c0_158 = arith.constant 0 : index
    %c0_159 = arith.constant 0 : index
    %374 = vector.load %arg7[%c0_158, %c0_159] : memref<64x4xf32, #tpu.memory_space<vmem>>, vector<64x4xf32>
    %cst_160 = arith.constant dense<0.000000e+00> : vector<16x4xf32>
    %375 = tpu.matmul %373, %374, %cst_160 {dimension_numbers = #tpu.dot_dimension_numbers<[1], [0], [0], [1], [0, 0, 1, 1], [], []>} : vector<16x64xf32>, vector<64x4xf32>, vector<16x4xf32> -> vector<16x4xf32>
    %c0_161 = arith.constant 0 : index
    %c0_162 = arith.constant 0 : index
    %376 = vector.load %arg8[%c0_161, %c0_162] : memref<1x4xf32, #tpu.memory_space<vmem>>, vector<1x4xf32>
    %377 = vector.broadcast %376 : vector<1x4xf32> to vector<16x4xf32>
    %378 = arith.addf %375, %377 : vector<16x4xf32>
    %c0_163 = arith.constant 0 : index
    %c0_164 = arith.constant 0 : index
    %379 = vector.load %arg9[%c0_163, %c0_164] : memref<16x4xf32, #tpu.memory_space<vmem>>, vector<16x4xf32>
    tpu.vector_store %arg9[%c0_163, %c0_164], %378 {strides = array<i32>} : memref<16x4xf32, #tpu.memory_space<vmem>>, vector<16x4xf32>,
    return
  }
}

</mosaic_0001>

<bundles_post_ra>
// kernel: tpu_custom_call.1
= control target key start
LH: loop header
LB: loop body
LE: loop exit
PB: predicated region body
PF: predicated region fallthrough
CT: control target
= control target key end

     0   :  { %vm122_vm0 = vcmask 1043456   ;;  %vm97_vm1 = vcmask 64512   ;;  %v2074_v1 = vmov 0.0   ;;  %vm2075_vm2 = vmmov 0   ;;  %s2561_s1 = inlined_call_operand.vmem [shape: bf16[8,64], index: 1, kind: input, shape index: {}]   ;;  %s2562_s0 = inlined_call_operand.vmem [shape: bf16[128,8], index: 0, kind: input, shape index: {}]   ;;  %s2563_s2 = inlined_call_operand.vmem [shape: bf16[64,64], index: 2, kind: input, shape index: {}]   ;;  %s2564_s3 = inlined_call_operand.vmem [shape: f32[1,64], index: 3, kind: input, shape index: {}]   ;;  %s2565_s4 = inlined_call_operand.vmem [shape: bf16[64,64], index: 4, kind: input, shape index: {}]   ;;  %s2566_s5 = inlined_call_operand.vmem [shape: bf16[64,64], index: 5, kind: input, shape index: {}]   ;;  %s2567_s6 = inlined_call_operand.vmem [shape: f32[1,64], index: 6, kind: input, shape index: {}]   ;;  %s2568_s7 = inlined_call_operand.vmem [shape: f32[64,4], index: 7, kind: input, shape index: {}]   ;;  %s2569_s8 = inlined_call_operand.vmem [shape: f32[1,4], index: 8, kind: input, shape index: {}]   ;;  %s2570_s9 = inlined_call_operand.vmem [shape: f32[16,4], index: 9, kind: output, shape index: {}]  }
   0x1   :  { %v49_v0 = vld [vmem:[%s2561_s1] sm:$0xf]  ;;  %1735 = vmatprep.subr.bf16.mxu1 %v2074_v1  ;;  %1743 = vmatprep.mubr.msk.bf16.mxu1 %vm2075_vm2, %v2074_v1  ;;  %v1991_v4 = vld [vmem:[%s2562_s0 + $0x8] sm:$0xff]   ;;  %v1992_v5 = vld [vmem:[%s2562_s0 + $0x10] sm:$0xff]   ;;  %v2076_v14 = vmov 0   ;;  %vm231_vm3 = vcmask 523264  }
   0x2   :  { %1986 = vmatprep.subr.msk.bf16.mxu0 %vm122_vm0, %v49_v0  ;;  %v124_v2 = vsel %vm122_vm0, %v49_v0, 0  ;;  %v1990_v3 = vld [vmem:[%s2562_s0] sm:$0xff]   ;;  %v1993_v7 = vld [vmem:[%s2562_s0 + $0x18] sm:$0xff]   ;;  %v2163_v9 = vld [vmem:[%s2563_s2 + $0x8] sm:$0xff]   ;;  %vm251_vm4 = vcmask 261120   ;;  %vm333_vm5 = vcmask 523520  }
   0x3   :  { %1718 = vmatpush3.bf16.msra.mxu0 %v124_v2  ;;  %1719 = vmatprep.mubr.msk.bf16.mxu0 %vm97_vm1, %v1990_v3  ;;  %v2149_v6 = vld [vmem:[%s2563_s2] sm:$0xff]   ;;  %v2171_v10 = vld [vmem:[%s2563_s2 + $0x10] sm:$0xff]   ;;  %v1995_v11 = vld [vmem:[%s2562_s0 + $0x28] sm:$0xff]   ;;  %vm1544_vm6 = vcmask 31744  }
   0x4   :  { %1759 = vmatprep.subr.bf16.mxu0 %v2074_v1  ;;  %v1994_v8 = vld [vmem:[%s2562_s0 + $0x20] sm:$0xff]   ;;  %1736 = vmatpush3.bf16.msra.mxu1 %v2149_v6  ;;  %v2184_v12 = vld [vmem:[%s2563_s2 + $0x18] sm:$0xff]   ;;  %v1997_v13 = vld [vmem:[%s2562_s0 + $0x30] sm:$0xff]  }
   0x5   :  { %1737 = vmatprep.subr.bf16.mxu1 %v2074_v1  ;;  %v1998_v15 = vld [vmem:[%s2562_s0 + $0x38] sm:$0xff]   ;;  %v1551_v17 = vld [vmem:[%s2564_s3] ss:$0 sm:$0xff] }
   0x6   :  { %1720 = vmatmul.mubr.msk.bf16.vlgmr.msra.gmra.mrb[0].mxu0 %vm97_vm1, %v1991_v4 }
   0x7   :  { %1723 = vmatprep.mubr.msk.bf16.mxu0 %vm97_vm1, %v1992_v5  ;;  %1760 = vmatpush3.bf16.msra.mxu0 %v2149_v6 }
   0x8   :  { %1761 = vmatprep.subr.bf16.mxu0 %v2074_v1  ;;  %1738 = vmatpush3.bf16.msra.mxu1 %v2163_v9 }
   0x9   :  { %1739 = vmatprep.subr.bf16.mxu1 %v2074_v1 }
   0xb   :  { %1762 = vmatpush3.bf16.msra.mxu0 %v2163_v9 }
   0xc   :  { %1763 = vmatprep.subr.bf16.mxu0 %v2074_v1  ;;  %1740 = vmatpush3.bf16.msra.mxu1 %v2171_v10 }
   0xd   :  { %1741 = vmatprep.subr.bf16.mxu1 %v2074_v1 }
   0xe   :  { %1724 = vmatmul.mubr.msk.bf16.gmra.mrb[4].mxu0 %vm97_vm1, %v1993_v7 }
   0xf   :  { %1727 = vmatprep.mubr.msk.bf16.mxu0 %vm97_vm1, %v1994_v8  ;;  %1764 = vmatpush3.bf16.msra.mxu0 %v2171_v10 }
  0x10   :  { %1765 = vmatprep.subr.bf16.mxu0 %v2074_v1  ;;  %1742 = vmatpush3.bf16.msra.mxu1 %v2184_v12 }
  0x11   :  { %1747 = vmatprep.subr.bf16.mxu1 %v2074_v1 }
  0x13   :  { %1766 = vmatpush3.bf16.msra.mxu0 %v2184_v12  ;;  %1744 = vmatmul.mubr.bf16.vlgmr.msra.gmra.mrb[0].mxu1 %v2076_v14 }
  0x14   :  { %1783 = vmatprep.subr.bf16.mxu0 %v2074_v1  ;;  %1748 = vmatpush3.bf16.msra.mxu1 %v2149_v6 }
  0x15   :  { %1755 = vmatprep.mubr.msk.bf16.mxu1 %vm2075_vm2, %v2074_v1  ;;  %1749 = vmatprep.subr.bf16.mxu1 %v2074_v1 }
  0x16   :  { %1728 = vmatmul.mubr.msk.bf16.gmra.mrb[8].mxu0 %vm97_vm1, %v1995_v11 }
  0x17   :  { %1731 = vmatprep.mubr.msk.bf16.mxu0 %vm97_vm1, %v1997_v13 }
  0x18   :  { %1750 = vmatpush3.bf16.msra.mxu1 %v2163_v9 }
  0x19   :  { %1751 = vmatprep.subr.bf16.mxu1 %v2074_v1 }
  0x1c   :  { %1752 = vmatpush3.bf16.msra.mxu1 %v2171_v10 }
  0x1d   :  { %1753 = vmatprep.subr.bf16.mxu1 %v2074_v1 }
  0x1e   :  { %1732 = vmatmul.mubr.msk.bf16.gmra.mrb[12].mxu0 %vm97_vm1, %v1998_v15 }
  0x1f   :  { %1767 = vmatprep.mubr.msk.bf16.mxu0 %vm2075_vm2, %v2074_v1 }
  0x20   :  { %1754 = vmatpush3.bf16.msra.mxu1 %v2184_v12 }
  0x21   :  { %1771 = vmatprep.subr.bf16.mxu1 %v2074_v1 }
  0xd9   :  { %v1721_v16 = vpop.f32.mrb[0].mxu0 }
  0xda   :  { %v160_v18 = vpop.f32.mrb[1].mxu0  ;;  %v169_v20 = vadd.f32 %v1721_v16, %v1551_v17 }
  0xdb   :  { %v1722_v19 = vpop.f32.mrb[2].mxu0  ;;  %v161_v23 = vadd.f32 %v1551_v17, %v160_v18 }
  0xdc   :  { %v172_v21 = vadd.f32 %v1722_v19, %v1551_v17  ;;  %v163_v22 = vpop.f32.mrb[3].mxu0 }
  0xdd   :  { %v164_v24 = vadd.f32 %v1551_v17, %v163_v22 }
  0xde   :  { %v224_v25 = vpack.c.bf16 %v172_v21, %v169_v20 }
  0xdf   :  { %v223_v26 = vpack.c.bf16 %v164_v24, %v161_v23 }
  0xe0   :  { %233 = vst.msk [vmem:[#allocation3 + $0x8] sm:$0xff] %vm231_vm3, %v224_v25 }
  0xe1   :  { %232 = vst.msk [vmem:[#allocation3] sm:$0xff] %vm231_vm3, %v223_v26  ;;  %v1725_v27 = vpop.f32.mrb[4].mxu0 }
  0xe2   :  { %v176_v28 = vpop.f32.mrb[5].mxu0  ;;  %v185_v30 = vadd.f32 %v1725_v27, %v1551_v17 }
  0xe3   :  { %v1726_v29 = vpop.f32.mrb[6].mxu0  ;;  %v177_v33 = vadd.f32 %v1551_v17, %v176_v28 }
  0xe4   :  { %v188_v31 = vadd.f32 %v1726_v29, %v1551_v17  ;;  %v179_v32 = vpop.f32.mrb[7].mxu0 }
  0xe5   :  { %v180_v34 = vadd.f32 %v1551_v17, %v179_v32 }
  0xe6   :  { %v226_v35 = vpack.c.bf16 %v188_v31, %v185_v30  ;;  %v319_v43 = vpop.f32.mrb[0].mxu1 }
  0xe7   :  { %v225_v36 = vpack.c.bf16 %v180_v34, %v177_v33  ;;  %v1745_v46 = vpop.f32.mrb[1].mxu1  ;;  %v2248_v13 = vld [vmem:[#allocation3 + $0x8] sm:$0xff] }
  0xe8   :  { %235 = vst.msk [vmem:[#allocation3 + $0x18] sm:$0xff] %vm231_vm3, %v226_v35  ;;  %v322_v48 = vpop.f32.mrb[2].mxu1  ;;  %v2226_v61 = vld [vmem:[#allocation3] sm:$0xff] }
  0xe9   :  { %234 = vst.msk [vmem:[#allocation3 + $0x10] sm:$0xff] %vm231_vm3, %v225_v36  ;;  %v1729_v37 = vpop.f32.mrb[8].mxu0  ;;  %v1746_v50 = vpop.f32.mrb[3].mxu1 }
  0xea   :  { %v192_v38 = vpop.f32.mrb[9].mxu0  ;;  %v201_v40 = vadd.f32 %v1729_v37, %v1551_v17 }
  0xeb   :  { %v1730_v39 = vpop.f32.mrb[10].mxu0  ;;  %v193_v44 = vadd.f32 %v1551_v17, %v192_v38 }
  0xec   :  { %v204_v41 = vadd.f32 %v1730_v39, %v1551_v17  ;;  %v195_v42 = vpop.f32.mrb[11].mxu0 }
  0xed   :  { %v196_v45 = vadd.f32 %v1551_v17, %v195_v42 }
  0xee   :  { %v228_v47 = vpack.c.bf16 %v204_v41, %v201_v40 }
  0xef   :  { %v227_v49 = vpack.c.bf16 %v196_v45, %v193_v44  ;;  %v462_v42 = vld [vmem:[#allocation3 + $0x18] sm:$0xff] }
  0xf0   :  { %237 = vst.msk [vmem:[#allocation3 + $0x28] sm:$0xff] %vm231_vm3, %v228_v47  ;;  %v2268_v28 = vld [vmem:[#allocation3 + $0x10] sm:$0xff] }
  0xf1   :  { %236 = vst.msk [vmem:[#allocation3 + $0x20] sm:$0xff] %vm231_vm3, %v227_v49  ;;  %v1733_v51 = vpop.f32.mrb[12].mxu0 }
  0xf2   :  { %v208_v52 = vpop.f32.mrb[13].mxu0  ;;  %v217_v54 = vadd.f32 %v1733_v51, %v1551_v17 }
  0xf3   :  { %v1734_v53 = vpop.f32.mrb[14].mxu0  ;;  %v209_v57 = vadd.f32 %v1551_v17, %v208_v52 }
  0xf4   :  { %v220_v55 = vadd.f32 %v1734_v53, %v1551_v17  ;;  %v211_v56 = vpop.f32.mrb[15].mxu0 }
  0xf5   :  { %v212_v58 = vadd.f32 %v1551_v17, %v211_v56 }
  0xf6   :  { %v230_v59 = vpack.c.bf16 %v220_v55, %v217_v54 }
  0xf7   :  { %v229_v60 = vpack.c.bf16 %v212_v58, %v209_v57  ;;  %v2266_v27 = vld [vmem:[#allocation3 + $0x28] sm:$0xff] }
  0xf8   :  { %239 = vst.msk [vmem:[#allocation3 + $0x38] sm:$0xff] %vm231_vm3, %v230_v59  ;;  %v404_v29 = vsel %vm251_vm4, %v2268_v28, %v2266_v27  ;;  %v464_v41 = vld [vmem:[#allocation3 + $0x20] sm:$0xff] }
  0xf9   :  { %238 = vst.msk [vmem:[#allocation3 + $0x30] sm:$0xff] %vm231_vm3, %v229_v60  ;;  %v406_v30 = vunpack.c.l.bf16 %v404_v29  ;;  %v407_v34 = vunpack.c.h.bf16 %v404_v29  ;;  %v528_v55 = vsel %vm251_vm4, %v464_v41, %v462_v42 }
  0xfa   :  { %v530_v56 = vunpack.c.l.bf16 %v528_v55  ;;  %v531_v60 = vunpack.c.h.bf16 %v528_v55 }
  0xff   :  { %v2228_v62 = vld [vmem:[#allocation3 + $0x38] sm:$0xff] }
 0x100   :  { %v254_v63 = vsel %vm251_vm4, %v2226_v61, %v2228_v62  ;;  %v2246_v11 = vld [vmem:[#allocation3 + $0x30] sm:$0xff] }
 0x101   :  { %v256_v0 = vunpack.c.l.bf16 %v254_v63  ;;  %v257_v2 = vunpack.c.h.bf16 %v254_v63  ;;  %v341_v15 = vsel %vm251_vm4, %v2248_v13, %v2246_v11 }
 0x102   :  { %v343_v16 = vunpack.c.l.bf16 %v341_v15  ;;  %v344_v20 = vunpack.c.h.bf16 %v341_v15 }
 0x103   :  { %v326_v3 = vadd.f32 %v319_v43, %v256_v0  ;;  %v327_v4 = vadd.f32 %v322_v48, %v257_v2  ;;  %v467_v43 = vsel %vm251_vm4, %v462_v42, %v464_v41 }
 0x104   :  { %v469_v44 = vunpack.c.l.bf16 %v467_v43  ;;  %v470_v48 = vunpack.c.h.bf16 %v467_v43 }
 0x105   :  { %2010 = vtanh.f32 %v326_v3 }
 0x106   :  { %2012 = vtanh.f32 %v327_v4 }
 0x10f   :  { %v2011_v5 = vpop.eup %2010 }
 0x110   :  { %v2013_v7 = vpop.eup %2012 }
 0x111   :  { %v330_v8 = vpack.c.bf16 %v2013_v7, %v2011_v5 }
 0x113   :  { %331 = vst.msk [vmem:[#allocation2] sm:$0xff] %vm251_vm4, %v330_v8  ;;  %1756 = vmatmul.mubr.msk.bf16.vlgmr.msra.gmra.mrb[4].mxu1 %vm231_vm3, %v330_v8 }
 0x114   :  { %334 = vst.msk [vmem:[#allocation2 + $0x38] sm:$0xff] %vm333_vm5, %v330_v8  ;;  %1772 = vmatpush3.bf16.msra.mxu1 %v2149_v6  ;;  %1779 = vmatprep.mubr.msk.bf16.mxu1 %vm2075_vm2, %v2074_v1 }
 0x115   :  { %1773 = vmatprep.subr.bf16.mxu1 %v2074_v1 }
 0x118   :  { %1774 = vmatpush3.bf16.msra.mxu1 %v2163_v9 }
 0x119   :  { %1775 = vmatprep.subr.bf16.mxu1 %v2074_v1 }
 0x11c   :  { %1776 = vmatpush3.bf16.msra.mxu1 %v2171_v10 }
 0x11d   :  { %1777 = vmatprep.subr.bf16.mxu1 %v2074_v1 }
 0x120   :  { %1778 = vmatpush3.bf16.msra.mxu1 %v2184_v12 }
 0x121   :  { %1795 = vmatprep.subr.bf16.mxu1 %v2074_v1 }
 0x1e6   :  { %v382_v17 = vpop.f32.mrb[4].mxu1 }
 0x1e7   :  { %v389_v18 = vadd.f32 %v382_v17, %v343_v16  ;;  %v1757_v19 = vpop.f32.mrb[5].mxu1 }
 0x1e8   :  { %v385_v21 = vpop.f32.mrb[6].mxu1 }
 0x1e9   :  { %v390_v22 = vadd.f32 %v385_v21, %v344_v20  ;;  %v1758_v23 = vpop.f32.mrb[7].mxu1  ;;  %2014 = vtanh.f32 %v389_v18 }
 0x1eb   :  { %2016 = vtanh.f32 %v390_v22 }
 0x1f3   :  { %v2015_v24 = vpop.eup %2014 }
 0x1f5   :  { %v2017_v25 = vpop.eup %2016 }
 0x1f6   :  { %v393_v26 = vpack.c.bf16 %v2017_v25, %v2015_v24 }
 0x1f8   :  { %395 = vst.msk [vmem:[#allocation2 + $0x8] sm:$0xff] %vm251_vm4, %v393_v26  ;;  %1768 = vmatmul.mubr.msk.bf16.vlgmr.msra.gmra.mrb[16].mxu0 %vm231_vm3, %v393_v26 }
 0x1f9   :  { %397 = vst.msk [vmem:[#allocation2 + $0x30] sm:$0xff] %vm333_vm5, %v393_v26  ;;  %1784 = vmatpush3.bf16.msra.mxu0 %v2149_v6  ;;  %1791 = vmatprep.mubr.msk.bf16.mxu0 %vm2075_vm2, %v2074_v1 }
 0x1fa   :  { %1785 = vmatprep.subr.bf16.mxu0 %v2074_v1 }
 0x1fd   :  { %1786 = vmatpush3.bf16.msra.mxu0 %v2163_v9 }
 0x1fe   :  { %1787 = vmatprep.subr.bf16.mxu0 %v2074_v1 }
 0x201   :  { %1788 = vmatpush3.bf16.msra.mxu0 %v2171_v10 }
 0x202   :  { %1789 = vmatprep.subr.bf16.mxu0 %v2074_v1 }
 0x205   :  { %1790 = vmatpush3.bf16.msra.mxu0 %v2184_v12 }
 0x206   :  { %1807 = vmatprep.subr.bf16.mxu0 %v2074_v1 }
 0x2cb   :  { %v445_v31 = vpop.f32.mrb[16].mxu0 }
 0x2cc   :  { %v452_v32 = vadd.f32 %v445_v31, %v406_v30  ;;  %v1769_v33 = vpop.f32.mrb[17].mxu0 }
 0x2cd   :  { %v448_v35 = vpop.f32.mrb[18].mxu0  ;;  %v2004_v33 = vld [vmem:[%s2565_s4 + $0x10] sm:$0xff]  }
 0x2ce   :  { %v453_v36 = vadd.f32 %v448_v35, %v407_v34  ;;  %v1770_v37 = vpop.f32.mrb[19].mxu0  ;;  %2018 = vtanh.f32 %v452_v32  ;;  %v2005_v34 = vld [vmem:[%s2565_s4 + $0x18] sm:$0xff]   ;;  %v2343_v35 = vld [vmem:[%s2566_s5] sm:$0xff]  }
 0x2cf   :  { %v2356_v37 = vld [vmem:[%s2566_s5 + $0x10] sm:$0xff]  }
 0x2d0   :  { %2020 = vtanh.f32 %v453_v36  ;;  %v2350_v36 = vld [vmem:[%s2566_s5 + $0x8] sm:$0xff]  }
 0x2d8   :  { %v2019_v38 = vpop.eup %2018 }
 0x2da   :  { %v2021_v39 = vpop.eup %2020 }
 0x2db   :  { %v456_v40 = vpack.c.bf16 %v2021_v39, %v2019_v38  ;;  %v2363_v38 = vld [vmem:[%s2566_s5 + $0x18] sm:$0xff]  }
 0x2dd   :  { %458 = vst.msk [vmem:[#allocation2 + $0x10] sm:$0xff] %vm251_vm4, %v456_v40  ;;  %1780 = vmatmul.mubr.msk.bf16.vlgmr.msra.gmra.mrb[8].mxu1 %vm231_vm3, %v456_v40 }
 0x2de   :  { %460 = vst.msk [vmem:[#allocation2 + $0x28] sm:$0xff] %vm333_vm5, %v456_v40  ;;  %1796 = vmatpush3.bf16.msra.mxu1 %v2149_v6  ;;  %1803 = vmatprep.mubr.msk.bf16.mxu1 %vm2075_vm2, %v2074_v1 }
 0x2df   :  { %1797 = vmatprep.subr.bf16.mxu1 %v2074_v1 }
 0x2e2   :  { %1798 = vmatpush3.bf16.msra.mxu1 %v2163_v9 }
 0x2e3   :  { %1799 = vmatprep.subr.bf16.mxu1 %v2074_v1 }
 0x2e6   :  { %1800 = vmatpush3.bf16.msra.mxu1 %v2171_v10 }
 0x2e7   :  { %1801 = vmatprep.subr.bf16.mxu1 %v2074_v1 }
 0x2ea   :  { %1802 = vmatpush3.bf16.msra.mxu1 %v2184_v12 }
 0x2eb   :  { %1819 = vmatprep.subr.bf16.mxu1 %v2074_v1 }
 0x3b0   :  { %v508_v45 = vpop.f32.mrb[8].mxu1 }
 0x3b1   :  { %v515_v46 = vadd.f32 %v508_v45, %v469_v44  ;;  %v1781_v47 = vpop.f32.mrb[9].mxu1 }
 0x3b2   :  { %v511_v49 = vpop.f32.mrb[10].mxu1 }
 0x3b3   :  { %v516_v50 = vadd.f32 %v511_v49, %v470_v48  ;;  %v1782_v51 = vpop.f32.mrb[11].mxu1  ;;  %2022 = vtanh.f32 %v515_v46 }
 0x3b5   :  { %2024 = vtanh.f32 %v516_v50 }
 0x3bd   :  { %v2023_v52 = vpop.eup %2022 }
 0x3bf   :  { %v2025_v53 = vpop.eup %2024 }
 0x3c0   :  { %v519_v54 = vpack.c.bf16 %v2025_v53, %v2023_v52 }
 0x3c2   :  { %521 = vst.msk [vmem:[#allocation2 + $0x18] sm:$0xff] %vm251_vm4, %v519_v54  ;;  %1792 = vmatmul.mubr.msk.bf16.vlgmr.msra.gmra.mrb[20].mxu0 %vm231_vm3, %v519_v54 }
 0x3c3   :  { %523 = vst.msk [vmem:[#allocation2 + $0x20] sm:$0xff] %vm333_vm5, %v519_v54  ;;  %1808 = vmatpush3.bf16.msra.mxu0 %v2149_v6  ;;  %1815 = vmatprep.mubr.msk.bf16.mxu0 %vm2075_vm2, %v2074_v1 }
 0x3c4   :  { %1809 = vmatprep.subr.bf16.mxu0 %v2074_v1 }
 0x3c7   :  { %1810 = vmatpush3.bf16.msra.mxu0 %v2163_v9 }
 0x3c8   :  { %1811 = vmatprep.subr.bf16.mxu0 %v2074_v1 }
 0x3cb   :  { %1812 = vmatpush3.bf16.msra.mxu0 %v2171_v10 }
 0x3cc   :  { %1813 = vmatprep.subr.bf16.mxu0 %v2074_v1 }
 0x3cf   :  { %1814 = vmatpush3.bf16.msra.mxu0 %v2184_v12 }
 0x495   :  { %v569_v57 = vpop.f32.mrb[20].mxu0 }
 0x496   :  { %v576_v58 = vadd.f32 %v569_v57, %v530_v56  ;;  %v1793_v59 = vpop.f32.mrb[21].mxu0 }
 0x497   :  { %v572_v63 = vpop.f32.mrb[22].mxu0 }
 0x498   :  { %v577_v0 = vadd.f32 %v572_v63, %v531_v60  ;;  %v1794_v2 = vpop.f32.mrb[23].mxu0  ;;  %2026 = vtanh.f32 %v576_v58  ;;  %v1579_v63 = vld [vmem:[%s2567_s6] ss:$0 sm:$0xff] }
 0x49a   :  { %2028 = vtanh.f32 %v577_v0 }
 0x4a2   :  { %v2027_v3 = vpop.eup %2026 }
 0x4a4   :  { %v2029_v4 = vpop.eup %2028 }
 0x4a5   :  { %v580_v5 = vpack.c.bf16 %v2029_v4, %v2027_v3 }
 0x4a7   :  { %581 = vst.msk [vmem:[#allocation2 + $0x20] sm:$0xff] %vm251_vm4, %v580_v5  ;;  %1804 = vmatmul.mubr.msk.bf16.vlgmr.msra.gmra.mrb[12].mxu1 %vm231_vm3, %v580_v5 }
 0x4a8   :  { %582 = vst.msk [vmem:[#allocation2 + $0x18] sm:$0xff] %vm333_vm5, %v580_v5  ;;  %1820 = vmatpush3.bf16.msra.mxu1 %v2149_v6  ;;  %1827 = vmatprep.mubr.msk.bf16.mxu1 %vm2075_vm2, %v2074_v1  ;;  %v587_v6 = vsel %vm251_vm4, %v2266_v27, %v2268_v28 }
 0x4a9   :  { %1821 = vmatprep.subr.bf16.mxu1 %v2074_v1  ;;  %v589_v7 = vunpack.c.l.bf16 %v587_v6  ;;  %v590_v17 = vunpack.c.h.bf16 %v587_v6 }
 0x4ac   :  { %1822 = vmatpush3.bf16.msra.mxu1 %v2163_v9 }
 0x4ad   :  { %1823 = vmatprep.subr.bf16.mxu1 %v2074_v1 }
 0x4ae   :  { %v764_v52 = vld [vmem:[#allocation2 + $0x20] sm:$0xff] }
 0x4af   :  { %v763_v51 = vld [vmem:[#allocation2 + $0x18] sm:$0xff] }
 0x4b0   :  { %1824 = vmatpush3.bf16.msra.mxu1 %v2171_v10 }
 0x4b1   :  { %1825 = vmatprep.subr.bf16.mxu1 %v2074_v1 }
 0x4b4   :  { %1826 = vmatpush3.bf16.msra.mxu1 %v2184_v12  ;;  %v646_v12 = vsel %vm251_vm4, %v2246_v11, %v2248_v13  ;;  %v2002_v11 = vld [vmem:[%s2565_s4] sm:$0xff]   ;;  %v2003_v13 = vld [vmem:[%s2565_s4 + $0x8] sm:$0xff]  }
 0x4b5   :  { %1855 = vmatprep.subr.bf16.mxu1 %v2074_v1  ;;  %v648_v22 = vunpack.c.l.bf16 %v646_v12  ;;  %v649_v26 = vunpack.c.h.bf16 %v646_v12  ;;  %1831 = vmatprep.subr.bf16.mxu0 %v2002_v11 }
 0x57a   :  { %v628_v8 = vpop.f32.mrb[12].mxu1 }
 0x57b   :  { %v635_v15 = vadd.f32 %v628_v8, %v589_v7  ;;  %v1805_v16 = vpop.f32.mrb[13].mxu1 }
 0x57c   :  { %v631_v9 = vpop.f32.mrb[14].mxu1 }
 0x57d   :  { %v636_v18 = vadd.f32 %v631_v9, %v590_v17  ;;  %v1806_v19 = vpop.f32.mrb[15].mxu1  ;;  %2030 = vtanh.f32 %v635_v15 }
 0x57f   :  { %2032 = vtanh.f32 %v636_v18 }
 0x587   :  { %v2031_v10 = vpop.eup %2030 }
 0x589   :  { %v2033_v20 = vpop.eup %2032 }
 0x58a   :  { %v639_v21 = vpack.c.bf16 %v2033_v20, %v2031_v10 }
 0x58c   :  { %640 = vst.msk [vmem:[#allocation2 + $0x28] sm:$0xff] %vm251_vm4, %v639_v21  ;;  %1816 = vmatmul.mubr.msk.bf16.vlgmr.msra.gmra.mrb[24].mxu0 %vm231_vm3, %v639_v21 }
 0x58d   :  { %641 = vst.msk [vmem:[#allocation2 + $0x10] sm:$0xff] %vm333_vm5, %v639_v21  ;;  %1832 = vmatpush3.bf16.msra.mxu0 %v2002_v11 }
 0x58e   :  { %1833 = vmatprep.subr.bf16.mxu0 %v2003_v13 }
 0x591   :  { %1834 = vmatpush3.bf16.msra.mxu0 %v2003_v13 }
 0x592   :  { %1835 = vmatprep.subr.bf16.mxu0 %v2004_v33 }
 0x593   :  { %v765_v53 = vld [vmem:[#allocation2 + $0x28] sm:$0xff] }
 0x595   :  { %1836 = vmatpush3.bf16.msra.mxu0 %v2004_v33 }
 0x596   :  { %1837 = vmatprep.subr.bf16.mxu0 %v2005_v34 }
 0x599   :  { %1838 = vmatpush3.bf16.msra.mxu0 %v2005_v34 }
 0x59a   :  { %1879 = vmatprep.subr.bf16.mxu0 %v2074_v1 }
 0x65f   :  { %v687_v23 = vpop.f32.mrb[24].mxu0 }
 0x660   :  { %v694_v24 = vadd.f32 %v687_v23, %v648_v22  ;;  %v1817_v25 = vpop.f32.mrb[25].mxu0 }
 0x661   :  { %v690_v27 = vpop.f32.mrb[26].mxu0 }
 0x662   :  { %v695_v28 = vadd.f32 %v690_v27, %v649_v26  ;;  %v1818_v29 = vpop.f32.mrb[27].mxu0  ;;  %2034 = vtanh.f32 %v694_v24 }
 0x664   :  { %2036 = vtanh.f32 %v695_v28 }
 0x66c   :  { %v2035_v30 = vpop.eup %2034 }
 0x66e   :  { %v2037_v31 = vpop.eup %2036 }
 0x66f   :  { %v698_v32 = vpack.c.bf16 %v2037_v31, %v2035_v30 }
 0x671   :  { %699 = vst.msk [vmem:[#allocation2 + $0x30] sm:$0xff] %vm251_vm4, %v698_v32  ;;  %1828 = vmatmul.mubr.msk.bf16.vlgmr.msra.gmra.mrb[16].mxu1 %vm231_vm3, %v698_v32 }
 0x672   :  { %700 = vst.msk [vmem:[#allocation2 + $0x8] sm:$0xff] %vm333_vm5, %v698_v32  ;;  %1863 = vmatprep.mubr.msk.bf16.mxu1 %vm2075_vm2, %v2074_v1  ;;  %1856 = vmatpush3.bf16.msra.mxu1 %v2343_v35 }
 0x673   :  { %1857 = vmatprep.subr.bf16.mxu1 %v2074_v1 }
 0x676   :  { %1858 = vmatpush3.bf16.msra.mxu1 %v2350_v36 }
 0x677   :  { %1859 = vmatprep.subr.bf16.mxu1 %v2074_v1 }
 0x678   :  { %v766_v54 = vld [vmem:[#allocation2 + $0x30] sm:$0xff] }
 0x67a   :  { %1860 = vmatpush3.bf16.msra.mxu1 %v2356_v37 }
 0x67b   :  { %1861 = vmatprep.subr.bf16.mxu1 %v2074_v1 }
 0x67e   :  { %1862 = vmatpush3.bf16.msra.mxu1 %v2363_v38 }
 0x67f   :  { %1867 = vmatprep.subr.bf16.mxu1 %v2074_v1 }
 0x681   :  { %1864 = vmatmul.mubr.bf16.vlgmr.msra.gmra.mrb[20].mxu1 %v2076_v14  ;;  %v705_v14 = vsel %vm251_vm4, %v2228_v62, %v2226_v61  ;;  %v761_v61 = vld [vmem:[#allocation2 + $0x8] sm:$0xff]  ;;  %v762_v62 = vld [vmem:[#allocation2 + $0x10] sm:$0xff] }
 0x682   :  { %1868 = vmatpush3.bf16.msra.mxu1 %v2343_v35  ;;  %1875 = vmatprep.mubr.msk.bf16.mxu1 %vm2075_vm2, %v2074_v1  ;;  %v707_v39 = vunpack.c.l.bf16 %v705_v14  ;;  %v708_v43 = vunpack.c.h.bf16 %v705_v14 }
 0x683   :  { %1869 = vmatprep.subr.bf16.mxu1 %v2074_v1 }
 0x686   :  { %1870 = vmatpush3.bf16.msra.mxu1 %v2350_v36 }
 0x687   :  { %1871 = vmatprep.subr.bf16.mxu1 %v2074_v1 }
 0x68a   :  { %1872 = vmatpush3.bf16.msra.mxu1 %v2356_v37 }
 0x68b   :  { %1873 = vmatprep.subr.bf16.mxu1 %v2074_v1 }
 0x68e   :  { %1874 = vmatpush3.bf16.msra.mxu1 %v2363_v38 }
 0x68f   :  { %1891 = vmatprep.subr.bf16.mxu1 %v2074_v1 }
 0x744   :  { %v746_v40 = vpop.f32.mrb[16].mxu1 }
 0x745   :  { %v753_v41 = vadd.f32 %v746_v40, %v707_v39  ;;  %v1829_v42 = vpop.f32.mrb[17].mxu1 }
 0x746   :  { %v749_v44 = vpop.f32.mrb[18].mxu1 }
 0x747   :  { %v754_v45 = vadd.f32 %v749_v44, %v708_v43  ;;  %v1830_v46 = vpop.f32.mrb[19].mxu1  ;;  %2038 = vtanh.f32 %v753_v41 }
 0x749   :  { %2040 = vtanh.f32 %v754_v45 }
 0x751   :  { %v2039_v47 = vpop.eup %2038 }
 0x753   :  { %v2041_v48 = vpop.eup %2040 }
 0x754   :  { %v757_v49 = vpack.c.bf16 %v2041_v48, %v2039_v47  ;;  %v2402_v56 = vpop.f32.mrb[20].mxu1 }
 0x755   :  { %v1865_v57 = vpop.f32.mrb[21].mxu1 }
 0x756   :  { %758 = vst.msk [vmem:[#allocation2 + $0x38] sm:$0xff] %vm251_vm4, %v757_v49  ;;  %v2404_v58 = vpop.f32.mrb[22].mxu1 }
 0x757   :  { %759 = vst.msk [vmem:[#allocation2] sm:$0xff] %vm333_vm5, %v757_v49  ;;  %v1866_v59 = vpop.f32.mrb[23].mxu1 }
 0x75d   :  { %v767_v55 = vld [vmem:[#allocation2 + $0x38] sm:$0xff] }
 0x75e   :  { %v760_v50 = vld [vmem:[#allocation2] sm:$0xff] }
 0x75f   :  { %1839 = vmatprep.mubr.msk.bf16.mxu0 %vm231_vm3, %v760_v50 }
 0x760   :  { %1840 = vmatmul.mubr.msk.bf16.vlgmr.msra.gmra.mrb[28].mxu0 %vm231_vm3, %v761_v61 }
 0x761   :  { %1843 = vmatprep.mubr.msk.bf16.mxu0 %vm231_vm3, %v762_v62  ;;  %1880 = vmatpush3.bf16.msra.mxu0 %v2343_v35 }
 0x762   :  { %1881 = vmatprep.subr.bf16.mxu0 %v2074_v1 }
 0x765   :  { %1882 = vmatpush3.bf16.msra.mxu0 %v2350_v36 }
 0x766   :  { %1883 = vmatprep.subr.bf16.mxu0 %v2074_v1 }
 0x768   :  { %1844 = vmatmul.mubr.msk.bf16.gmra.mrb[32].mxu0 %vm231_vm3, %v763_v51 }
 0x769   :  { %1847 = vmatprep.mubr.msk.bf16.mxu0 %vm231_vm3, %v764_v52  ;;  %1884 = vmatpush3.bf16.msra.mxu0 %v2356_v37 }
 0x76a   :  { %1885 = vmatprep.subr.bf16.mxu0 %v2074_v1 }
 0x76d   :  { %1886 = vmatpush3.bf16.msra.mxu0 %v2363_v38 }
 0x76e   :  { %1903 = vmatprep.subr.bf16.mxu0 %v2074_v1 }
 0x770   :  { %1848 = vmatmul.mubr.msk.bf16.gmra.mrb[36].mxu0 %vm231_vm3, %v765_v53 }
 0x771   :  { %1851 = vmatprep.mubr.msk.bf16.mxu0 %vm231_vm3, %v766_v54 }
 0x778   :  { %1852 = vmatmul.mubr.msk.bf16.gmra.mrb[40].mxu0 %vm231_vm3, %v767_v55 }
 0x779   :  { %1887 = vmatprep.mubr.msk.bf16.mxu0 %vm2075_vm2, %v2074_v1 }
 0x833   :  { %v1841_v60 = vpop.f32.mrb[28].mxu0 }
 0x834   :  { %v865_v0 = vpop.f32.mrb[29].mxu0  ;;  %v874_v3 = vadd.f32 %v1841_v60, %v1579_v63 }
 0x835   :  { %v1842_v2 = vpop.f32.mrb[30].mxu0  ;;  %v866_v6 = vadd.f32 %v1579_v63, %v865_v0 }
 0x836   :  { %v877_v4 = vadd.f32 %v1842_v2, %v1579_v63  ;;  %v868_v5 = vpop.f32.mrb[31].mxu0 }
 0x837   :  { %v869_v7 = vadd.f32 %v1579_v63, %v868_v5 }
 0x838   :  { %v929_v8 = vpack.c.bf16 %v877_v4, %v874_v3 }
 0x839   :  { %v928_v15 = vpack.c.bf16 %v869_v7, %v866_v6 }
 0x83a   :  { %937 = vst.msk [vmem:[#allocation3 + $0x8] sm:$0xff] %vm231_vm3, %v929_v8 }
 0x83b   :  { %936 = vst.msk [vmem:[#allocation3] sm:$0xff] %vm231_vm3, %v928_v15  ;;  %v1845_v16 = vpop.f32.mrb[32].mxu0 }
 0x83c   :  { %v881_v17 = vpop.f32.mrb[33].mxu0  ;;  %v890_v18 = vadd.f32 %v1845_v16, %v1579_v63 }
 0x83d   :  { %v1846_v9 = vpop.f32.mrb[34].mxu0  ;;  %v882_v20 = vadd.f32 %v1579_v63, %v881_v17 }
 0x83e   :  { %v893_v19 = vadd.f32 %v1846_v9, %v1579_v63  ;;  %v884_v10 = vpop.f32.mrb[35].mxu0 }
 0x83f   :  { %v885_v21 = vadd.f32 %v1579_v63, %v884_v10 }
 0x840   :  { %v931_v12 = vpack.c.bf16 %v893_v19, %v890_v18 }
 0x841   :  { %v930_v22 = vpack.c.bf16 %v885_v21, %v882_v20  ;;  %v1032_v51 = vld [vmem:[#allocation3 + $0x8] sm:$0xff] }
 0x842   :  { %939 = vst.msk [vmem:[#allocation3 + $0x18] sm:$0xff] %vm231_vm3, %v931_v12  ;;  %v952_v50 = vld [vmem:[#allocation3] sm:$0xff] }
 0x843   :  { %938 = vst.msk [vmem:[#allocation3 + $0x10] sm:$0xff] %vm231_vm3, %v930_v22  ;;  %v1849_v23 = vpop.f32.mrb[36].mxu0 }
 0x844   :  { %v897_v24 = vpop.f32.mrb[37].mxu0  ;;  %v906_v26 = vadd.f32 %v1849_v23, %v1579_v63 }
 0x845   :  { %v1850_v25 = vpop.f32.mrb[38].mxu0  ;;  %v898_v29 = vadd.f32 %v1579_v63, %v897_v24 }
 0x846   :  { %v909_v27 = vadd.f32 %v1850_v25, %v1579_v63  ;;  %v900_v28 = vpop.f32.mrb[39].mxu0 }
 0x847   :  { %v901_v30 = vadd.f32 %v1579_v63, %v900_v28 }
 0x848   :  { %v933_v31 = vpack.c.bf16 %v909_v27, %v906_v26 }
 0x849   :  { %v932_v32 = vpack.c.bf16 %v901_v30, %v898_v29  ;;  %v2418_v46 = vld [vmem:[#allocation3 + $0x18] sm:$0xff] }
 0x84a   :  { %941 = vst.msk [vmem:[#allocation3 + $0x28] sm:$0xff] %vm231_vm3, %v933_v31  ;;  %v2415_v44 = vld [vmem:[#allocation3 + $0x10] sm:$0xff] }
 0x84b   :  { %940 = vst.msk [vmem:[#allocation3 + $0x20] sm:$0xff] %vm231_vm3, %v932_v32  ;;  %v1853_v11 = vpop.f32.mrb[40].mxu0 }
 0x84c   :  { %v913_v13 = vpop.f32.mrb[41].mxu0  ;;  %v922_v34 = vadd.f32 %v1853_v11, %v1579_v63 }
 0x84d   :  { %v1854_v33 = vpop.f32.mrb[42].mxu0  ;;  %v914_v40 = vadd.f32 %v1579_v63, %v913_v13 }
 0x84e   :  { %v925_v14 = vadd.f32 %v1854_v33, %v1579_v63  ;;  %v916_v39 = vpop.f32.mrb[43].mxu0 }
 0x84f   :  { %v917_v41 = vadd.f32 %v1579_v63, %v916_v39 }
 0x850   :  { %v935_v42 = vpack.c.bf16 %v925_v14, %v922_v34 }
 0x851   :  { %v934_v43 = vpack.c.bf16 %v917_v41, %v914_v40  ;;  %v1092_v45 = vld [vmem:[#allocation3 + $0x28] sm:$0xff] }
 0x852   :  { %943 = vst.msk [vmem:[#allocation3 + $0x38] sm:$0xff] %vm231_vm3, %v935_v42  ;;  %v2420_v47 = vld [vmem:[#allocation3 + $0x20] sm:$0xff]  ;;  %v2424_v48 = vsel %vm251_vm4, %v1092_v45, %v2415_v44  ;;  %v1095_v18 = vsel %vm251_vm4, %v2415_v44, %v1092_v45 }
 0x853   :  { %942 = vst.msk [vmem:[#allocation3 + $0x30] sm:$0xff] %vm231_vm3, %v934_v43  ;;  %v2430_v49 = vsel %vm251_vm4, %v2420_v47, %v2418_v46  ;;  %v1097_v19 = vunpack.c.l.bf16 %v1095_v18  ;;  %v1098_v12 = vunpack.c.h.bf16 %v1095_v18  ;;  %v1154_v28 = vsel %vm251_vm4, %v2418_v46, %v2420_v47  ;;  %v1452_v18 = vld [vmem:[%s2568_s7 + $0x20] sm:$0xff] }
 0x854   :  { %v1156_v29 = vunpack.c.l.bf16 %v1154_v28  ;;  %v1157_v11 = vunpack.c.h.bf16 %v1154_v28  ;;  %v1215_v41 = vunpack.c.l.bf16 %v2430_v49  ;;  %v1216_v45 = vunpack.c.h.bf16 %v2430_v49 }
 0x855   :  { %v1274_v49 = vunpack.c.l.bf16 %v2424_v48 }
 0x859   :  { %v953_v61 = vld [vmem:[#allocation3 + $0x38] sm:$0xff] }
 0x85a   :  { %v956_v62 = vsel %vm251_vm4, %v952_v50, %v953_v61  ;;  %v1033_v52 = vld [vmem:[#allocation3 + $0x30] sm:$0xff]  ;;  %v2434_v53 = vsel %vm251_vm4, %v953_v61, %v952_v50 }
 0x85b   :  { %v958_v54 = vunpack.c.l.bf16 %v956_v62  ;;  %v959_v55 = vunpack.c.h.bf16 %v956_v62  ;;  %v2437_v57 = vsel %vm251_vm4, %v1033_v52, %v1032_v51 }
 0x85d   :  { %v1025_v59 = vadd.f32 %v2402_v56, %v958_v54  ;;  %v1026_v60 = vadd.f32 %v2404_v58, %v959_v55  ;;  %v1036_v56 = vsel %vm251_vm4, %v1032_v51, %v1033_v52  ;;  %v1275_v55 = vunpack.c.h.bf16 %v2424_v48 }
 0x85e   :  { %v1038_v58 = vunpack.c.l.bf16 %v1036_v56  ;;  %v1039_v6 = vunpack.c.h.bf16 %v1036_v56  ;;  %v1334_v48 = vunpack.c.h.bf16 %v2437_v57 }
 0x85f   :  { %2042 = vtanh.f32 %v1025_v59 }
 0x860   :  { %2044 = vtanh.f32 %v1026_v60 }
 0x869   :  { %v2043_v63 = vpop.eup %2042 }
 0x86a   :  { %v2045_v0 = vpop.eup %2044 }
 0x86b   :  { %v1029_v2 = vpack.c.bf16 %v2045_v0, %v2043_v63 }
 0x86d   :  { %1876 = vmatmul.mubr.msk.bf16.vlgmr.msra.gmra.mrb[24].mxu1 %vm231_vm3, %v1029_v2  ;;  %1030 = vst.msk [vmem:[#allocation2] sm:$0xff] %vm251_vm4, %v1029_v2 }
 0x86e   :  { %1031 = vst.msk [vmem:[#allocation2 + $0x38] sm:$0xff] %vm333_vm5, %v1029_v2  ;;  %1892 = vmatpush3.bf16.msra.mxu1 %v2343_v35  ;;  %1899 = vmatprep.mubr.msk.bf16.mxu1 %vm2075_vm2, %v2074_v1 }
 0x86f   :  { %1893 = vmatprep.subr.bf16.mxu1 %v2074_v1 }
 0x872   :  { %1894 = vmatpush3.bf16.msra.mxu1 %v2350_v36 }
 0x873   :  { %1895 = vmatprep.subr.bf16.mxu1 %v2074_v1 }
 0x876   :  { %1896 = vmatpush3.bf16.msra.mxu1 %v2356_v37 }
 0x877   :  { %1897 = vmatprep.subr.bf16.mxu1 %v2074_v1 }
 0x87a   :  { %1898 = vmatpush3.bf16.msra.mxu1 %v2363_v38 }
 0x87b   :  { %1915 = vmatprep.subr.bf16.mxu1 %v2074_v1 }
 0x940   :  { %v1077_v3 = vpop.f32.mrb[24].mxu1 }
 0x941   :  { %v1084_v4 = vadd.f32 %v1077_v3, %v1038_v58  ;;  %v1877_v5 = vpop.f32.mrb[25].mxu1 }
 0x942   :  { %v1080_v7 = vpop.f32.mrb[26].mxu1 }
 0x943   :  { %v1085_v8 = vadd.f32 %v1080_v7, %v1039_v6  ;;  %v1878_v15 = vpop.f32.mrb[27].mxu1  ;;  %2046 = vtanh.f32 %v1084_v4 }
 0x945   :  { %2048 = vtanh.f32 %v1085_v8  ;;  %v1448_v8 = vld [vmem:[%s2568_s7] sm:$0xff] }
 0x94d   :  { %v2047_v16 = vpop.eup %2046 }
 0x94f   :  { %v2049_v17 = vpop.eup %2048 }
 0x950   :  { %v1088_v9 = vpack.c.bf16 %v2049_v17, %v2047_v16  ;;  %v1450_v16 = vld [vmem:[%s2568_s7 + $0x10] sm:$0xff]  ;;  %v1451_v17 = vld [vmem:[%s2568_s7 + $0x18] sm:$0xff] }
 0x952   :  { %1089 = vst.msk [vmem:[#allocation2 + $0x8] sm:$0xff] %vm251_vm4, %v1088_v9  ;;  %1888 = vmatmul.mubr.msk.bf16.vlgmr.msra.gmra.mrb[44].mxu0 %vm231_vm3, %v1088_v9 }
 0x953   :  { %1090 = vst.msk [vmem:[#allocation2 + $0x30] sm:$0xff] %vm333_vm5, %v1088_v9  ;;  %1904 = vmatpush3.bf16.msra.mxu0 %v2343_v35  ;;  %1911 = vmatprep.mubr.msk.bf16.mxu0 %vm2075_vm2, %v2074_v1  ;;  %v1974_v9 = vpack.c.bf16 %v1451_v17, %v1450_v16 }
 0x954   :  { %1905 = vmatprep.subr.bf16.mxu0 %v2074_v1 }
 0x957   :  { %1906 = vmatpush3.bf16.msra.mxu0 %v2350_v36 }
 0x958   :  { %1907 = vmatprep.subr.bf16.mxu0 %v2074_v1 }
 0x95b   :  { %1908 = vmatpush3.bf16.msra.mxu0 %v2356_v37 }
 0x95c   :  { %1909 = vmatprep.subr.bf16.mxu0 %v2074_v1 }
 0x95f   :  { %1910 = vmatpush3.bf16.msra.mxu0 %v2363_v38 }
 0x960   :  { %1927 = vmatprep.subr.bf16.mxu0 %v2074_v1 }
 0xa25   :  { %v1136_v10 = vpop.f32.mrb[44].mxu0 }
 0xa26   :  { %v1143_v20 = vadd.f32 %v1136_v10, %v1097_v19  ;;  %v1889_v21 = vpop.f32.mrb[45].mxu0  ;;  %v1453_v19 = vld [vmem:[%s2568_s7 + $0x28] sm:$0xff]  ;;  %v1454_v10 = vld [vmem:[%s2568_s7 + $0x30] sm:$0xff] }
 0xa27   :  { %v1139_v22 = vpop.f32.mrb[46].mxu0  ;;  %v1455_v21 = vld [vmem:[%s2568_s7 + $0x38] sm:$0xff] }
 0xa28   :  { %v1144_v23 = vadd.f32 %v1139_v22, %v1098_v12  ;;  %v1890_v24 = vpop.f32.mrb[47].mxu0  ;;  %2050 = vtanh.f32 %v1143_v20  ;;  %v1978_v20 = vpack.c.bf16 %v1453_v19, %v1452_v18  ;;  %v1982_v12 = vpack.c.bf16 %v1455_v21, %v1454_v10 }
 0xa29   :  { %v1392_v22 = vunpack.c.l.bf16 %v2434_v53 }
 0xa2a   :  { %2052 = vtanh.f32 %v1144_v23 }
 0xa32   :  { %v2051_v25 = vpop.eup %2050 }
 0xa34   :  { %v2053_v26 = vpop.eup %2052 }
 0xa35   :  { %v1147_v27 = vpack.c.bf16 %v2053_v26, %v2051_v25  ;;  %v1393_v26 = vunpack.c.h.bf16 %v2434_v53  ;;  %v1603_v53 = vld [vmem:[%s2569_s8] ss:$0 sm:$0xff] }
 0xa37   :  { %1900 = vmatmul.mubr.msk.bf16.vlgmr.msra.gmra.mrb[28].mxu1 %vm231_vm3, %v1147_v27  ;;  %1148 = vst.msk [vmem:[#allocation2 + $0x10] sm:$0xff] %vm251_vm4, %v1147_v27 }
 0xa38   :  { %1149 = vst.msk [vmem:[#allocation2 + $0x28] sm:$0xff] %vm333_vm5, %v1147_v27  ;;  %1916 = vmatpush3.bf16.msra.mxu1 %v2343_v35  ;;  %1923 = vmatprep.mubr.msk.bf16.mxu1 %vm2075_vm2, %v2074_v1 }
 0xa39   :  { %1917 = vmatprep.subr.bf16.mxu1 %v2074_v1 }
 0xa3c   :  { %1918 = vmatpush3.bf16.msra.mxu1 %v2350_v36 }
 0xa3d   :  { %1919 = vmatprep.subr.bf16.mxu1 %v2074_v1 }
 0xa40   :  { %1920 = vmatpush3.bf16.msra.mxu1 %v2356_v37 }
 0xa41   :  { %1921 = vmatprep.subr.bf16.mxu1 %v2074_v1 }
 0xa44   :  { %1922 = vmatpush3.bf16.msra.mxu1 %v2363_v38 }
 0xa45   :  { %1939 = vmatprep.subr.bf16.mxu1 %v2074_v1 }
 0xb0a   :  { %v1195_v30 = vpop.f32.mrb[28].mxu1 }
 0xb0b   :  { %v1202_v31 = vadd.f32 %v1195_v30, %v1156_v29  ;;  %v1901_v32 = vpop.f32.mrb[29].mxu1 }
 0xb0c   :  { %v1198_v13 = vpop.f32.mrb[30].mxu1 }
 0xb0d   :  { %v1203_v33 = vadd.f32 %v1198_v13, %v1157_v11  ;;  %v1902_v34 = vpop.f32.mrb[31].mxu1  ;;  %2054 = vtanh.f32 %v1202_v31 }
 0xb0f   :  { %2056 = vtanh.f32 %v1203_v33 }
 0xb17   :  { %v2055_v14 = vpop.eup %2054 }
 0xb19   :  { %v2057_v39 = vpop.eup %2056 }
 0xb1a   :  { %v1206_v40 = vpack.c.bf16 %v2057_v39, %v2055_v14 }
 0xb1c   :  { %1912 = vmatmul.mubr.msk.bf16.vlgmr.msra.gmra.mrb[48].mxu0 %vm231_vm3, %v1206_v40  ;;  %1207 = vst.msk [vmem:[#allocation2 + $0x18] sm:$0xff] %vm251_vm4, %v1206_v40 }
 0xb1d   :  { %1208 = vst.msk [vmem:[#allocation2 + $0x20] sm:$0xff] %vm333_vm5, %v1206_v40  ;;  %1928 = vmatpush3.bf16.msra.mxu0 %v2343_v35  ;;  %1935 = vmatprep.mubr.msk.bf16.mxu0 %vm2075_vm2, %v2074_v1 }
 0xb1e   :  { %1929 = vmatprep.subr.bf16.mxu0 %v2074_v1 }
 0xb21   :  { %1930 = vmatpush3.bf16.msra.mxu0 %v2350_v36 }
 0xb22   :  { %1931 = vmatprep.subr.bf16.mxu0 %v2074_v1 }
 0xb25   :  { %1932 = vmatpush3.bf16.msra.mxu0 %v2356_v37 }
 0xb26   :  { %1933 = vmatprep.subr.bf16.mxu0 %v2074_v1 }
 0xb29   :  { %1934 = vmatpush3.bf16.msra.mxu0 %v2363_v38 }
 0xbef   :  { %v1254_v42 = vpop.f32.mrb[48].mxu0 }
 0xbf0   :  { %v1261_v43 = vadd.f32 %v1254_v42, %v1215_v41  ;;  %v1913_v44 = vpop.f32.mrb[49].mxu0 }
 0xbf1   :  { %v1257_v46 = vpop.f32.mrb[50].mxu0 }
 0xbf2   :  { %v1262_v47 = vadd.f32 %v1257_v46, %v1216_v45  ;;  %v1914_v50 = vpop.f32.mrb[51].mxu0  ;;  %2058 = vtanh.f32 %v1261_v43 }
 0xbf4   :  { %2060 = vtanh.f32 %v1262_v47 }
 0xbfc   :  { %v2059_v61 = vpop.eup %2058 }
 0xbfe   :  { %v2061_v62 = vpop.eup %2060 }
 0xbff   :  { %v1265_v51 = vpack.c.bf16 %v2061_v62, %v2059_v61 }
 0xc01   :  { %1266 = vst.msk [vmem:[#allocation2 + $0x20] sm:$0xff] %vm251_vm4, %v1265_v51  ;;  %1924 = vmatmul.mubr.msk.bf16.vlgmr.msra.gmra.mrb[32].mxu1 %vm231_vm3, %v1265_v51 }
 0xc02   :  { %1267 = vst.msk [vmem:[#allocation2 + $0x18] sm:$0xff] %vm333_vm5, %v1265_v51  ;;  %1940 = vmatpush3.bf16.msra.mxu1 %v2343_v35  ;;  %1947 = vmatprep.mubr.msk.bf16.mxu1 %vm2075_vm2, %v2074_v1 }
 0xc03   :  { %1941 = vmatprep.subr.bf16.mxu1 %v2074_v1 }
 0xc06   :  { %1942 = vmatpush3.bf16.msra.mxu1 %v2350_v36 }
 0xc07   :  { %1943 = vmatprep.subr.bf16.mxu1 %v2074_v1 }
 0xc0a   :  { %1944 = vmatpush3.bf16.msra.mxu1 %v2356_v37 }
 0xc0b   :  { %1945 = vmatprep.subr.bf16.mxu1 %v2074_v1  ;;  %v1333_v1 = vunpack.c.l.bf16 %v2437_v57  ;;  %v1449_v57 = vld [vmem:[%s2568_s7 + $0x8] sm:$0xff] }
 0xc0c   :  { %v1970_v15 = vpack.c.bf16 %v1449_v57, %v1448_v8 }
 0xc0e   :  { %1946 = vmatpush3.bf16.msra.mxu1 %v2363_v38  ;;  %1971 = vmatprep.subr.bf16.mxu0 %v1970_v15 }
 0xcd4   :  { %v1313_v52 = vpop.f32.mrb[32].mxu1 }
 0xcd5   :  { %v1320_v54 = vadd.f32 %v1313_v52, %v1274_v49  ;;  %v1925_v35 = vpop.f32.mrb[33].mxu1 }
 0xcd6   :  { %v1316_v59 = vpop.f32.mrb[34].mxu1 }
 0xcd7   :  { %v1321_v60 = vadd.f32 %v1316_v59, %v1275_v55  ;;  %v1926_v63 = vpop.f32.mrb[35].mxu1  ;;  %2062 = vtanh.f32 %v1320_v54 }
 0xcd9   :  { %2064 = vtanh.f32 %v1321_v60 }
 0xce1   :  { %v2063_v36 = vpop.eup %2062 }
 0xce3   :  { %v2065_v0 = vpop.eup %2064 }
 0xce4   :  { %v1324_v2 = vpack.c.bf16 %v2065_v0, %v2063_v36 }
 0xce6   :  { %1325 = vst.msk [vmem:[#allocation2 + $0x28] sm:$0xff] %vm251_vm4, %v1324_v2  ;;  %1936 = vmatmul.mubr.msk.bf16.vlgmr.msra.gmra.mrb[52].mxu0 %vm231_vm3, %v1324_v2 }
 0xce7   :  { %1326 = vst.msk [vmem:[#allocation2 + $0x10] sm:$0xff] %vm333_vm5, %v1324_v2  ;;  %1973 = vmatpush3.bf16.msra.mxu0 %v1970_v15 }
 0xce8   :  { %1975 = vmatprep.subr.bf16.mxu0 %v1974_v9 }
 0xceb   :  { %1977 = vmatpush3.bf16.msra.mxu0 %v1974_v9 }
 0xcec   :  { %1979 = vmatprep.subr.bf16.mxu0 %v1978_v20 }
 0xcef   :  { %1981 = vmatpush3.bf16.msra.mxu0 %v1978_v20 }
 0xcf0   :  { %1983 = vmatprep.subr.bf16.mxu0 %v1982_v12 }
 0xcf3   :  { %1985 = vmatpush3.bf16.msra.mxu0 %v1982_v12 }
 0xdb9   :  { %v1372_v37 = vpop.f32.mrb[52].mxu0 }
 0xdba   :  { %v1379_v38 = vadd.f32 %v1372_v37, %v1333_v1  ;;  %v1937_v56 = vpop.f32.mrb[53].mxu0 }
 0xdbb   :  { %v1375_v58 = vpop.f32.mrb[54].mxu0 }
 0xdbc   :  { %v1380_v3 = vadd.f32 %v1375_v58, %v1334_v48  ;;  %v1938_v4 = vpop.f32.mrb[55].mxu0  ;;  %2066 = vtanh.f32 %v1379_v38 }
 0xdbe   :  { %2068 = vtanh.f32 %v1380_v3 }
 0xdc6   :  { %v2067_v5 = vpop.eup %2066 }
 0xdc8   :  { %v2069_v6 = vpop.eup %2068 }
 0xdc9   :  { %v1383_v7 = vpack.c.bf16 %v2069_v6, %v2067_v5 }
 0xdcb   :  { %1384 = vst.msk [vmem:[#allocation2 + $0x30] sm:$0xff] %vm251_vm4, %v1383_v7  ;;  %1948 = vmatmul.mubr.msk.bf16.vlgmr.msra.gmra.mrb[36].mxu1 %vm231_vm3, %v1383_v7 }
 0xdcc   :  { %1385 = vst.msk [vmem:[#allocation2 + $0x8] sm:$0xff] %vm333_vm5, %v1383_v7 }
 0xe9e   :  { %v1431_v23 = vpop.f32.mrb[36].mxu1 }
 0xe9f   :  { %v1438_v24 = vadd.f32 %v1431_v23, %v1392_v22  ;;  %v1949_v25 = vpop.f32.mrb[37].mxu1 }
 0xea0   :  { %v1434_v27 = vpop.f32.mrb[38].mxu1 }
 0xea1   :  { %v1439_v28 = vadd.f32 %v1434_v27, %v1393_v26  ;;  %v1950_v29 = vpop.f32.mrb[39].mxu1  ;;  %2070 = vtanh.f32 %v1438_v24 }
 0xea3   :  { %2072 = vtanh.f32 %v1439_v28 }
 0xeab   :  { %v2071_v30 = vpop.eup %2070 }
 0xead   :  { %v2073_v31 = vpop.eup %2072 }
 0xeae   :  { %v1442_v32 = vpack.c.bf16 %v2073_v31, %v2071_v30 }
 0xeb0   :  { %1443 = vst.msk [vmem:[#allocation2 + $0x38] sm:$0xff] %vm251_vm4, %v1442_v32 }
 0xeb1   :  { %1444 = vst.msk [vmem:[#allocation2] sm:$0xff] %vm333_vm5, %v1442_v32 }
 0xeb7   :  { %v1445_v11 = vld [vmem:[#allocation2 + $0x38] sm:$0xff] }
 0xeb8   :  { %v1446_v13 = vunpack.c.l.bf16 %v1445_v11  ;;  %v1447_v33 = vunpack.c.h.bf16 %v1445_v11 }
 0xeba   :  { %1967 = vmatprep.mubr.msk.f32.mxu0 %vm231_vm3, %v1446_v13 }
 0xebb   :  { %1968 = vmatmul.mubr.msk.f32.vlgmr.msra.gmra.mrb[56].mxu0 %vm231_vm3, %v1447_v33 }
 0xf8e   :  { %v1969_v34 = vpop.f32.mrb[56].mxu0 }
 0xf8f   :  { %v1541_v14 = vadd.f32 %v1969_v34, %v1603_v53  ;;  %v1535_v39 = vpop.f32.mrb[57].mxu0 }
 0xf90   :  { %v1536_v40 = vadd.f32 %v1603_v53, %v1535_v39 }
 0xf91   :  { %1546 = vst.msk [vmem:[%s2570_s9 + $0x8] sm:$0xff] %vm1544_vm6, %v1541_v14 }
 0xf92   :  { %1545 = vst.msk [vmem:[%s2570_s9] sm:$0xff] %vm1544_vm6, %v1536_v40 }

</bundles_post_ra>
